<compile_context>
chip_gen: v6e
topology: v6e:2x2x1
jax: 0.10.0
libtpu: 0.0.40
codegen_flags: <defaults>
</compile_context>

<pallas_src>
import numpy as np
import jax
import jax.numpy as jnp
from jax import lax
from jax.experimental import pallas as pl
from jax.experimental.pallas import tpu as pltpu

NUM_HEADS = 4
LN_EPS = 1e-5


def _round_up(x, m):
    return (x + m - 1) // m * m


def _layernorm(x, g, b):
    mu = jnp.mean(x, axis=-1, keepdims=True)
    var = jnp.mean((x - mu) ** 2, axis=-1, keepdims=True)
    return (x - mu) * lax.rsqrt(var + LN_EPS) * g + b


def merged_kernel(s1_ref, s2_ref, rep_ref, oh_ref, oht_ref,
                  w_tk1, b_tk1, w_tk2, b_tk2,
                  wq, bq, wk, bk, wv, bv, wo, bo,
                  ln0_g, ln0_b, ln1_g, ln1_b,
                  w_f1, b_f1, w_f2, b_f2,
                  out_ref):
    f32 = jnp.float32
    s1 = s1_ref[...]        # (TB, s1_dim)
    s2 = s2_ref[...]        # (TB*N, s2_dim)  -- tokens, batch-major flattened
    R = rep_ref[...]        # (TB*N, TB)      -- R[b*N+j, b] = 1
    oh = oh_ref[...]        # (W, H)          -- head one-hot, pre-scaled by 1/sqrt(W)
    ohT = oht_ref[...]      # (H, W)          -- head one-hot (unscaled)

    # ---- Tokenizers (Linear + ReLU) ----
    state = jnp.maximum(jnp.dot(s1, w_tk1[...], preferred_element_type=f32) + b_tk1[...], 0.0)  # (TB, W)
    xt = jnp.maximum(jnp.dot(s2, w_tk2[...], preferred_element_type=f32) + b_tk2[...], 0.0)     # (TB*N, W)

    # ---- MAB projections; state key/value handled separately (no concat) ----
    q = jnp.dot(state, wq[...], preferred_element_type=f32) + bq[...]       # (TB, W)
    k_x = jnp.dot(xt, wk[...], preferred_element_type=f32) + bk[...]        # (TB*N, W)
    v_x = jnp.dot(xt, wv[...], preferred_element_type=f32) + bv[...]        # (TB*N, W)
    k_s = jnp.dot(state, wk[...], preferred_element_type=f32) + bk[...]     # (TB, W)
    v_s = jnp.dot(state, wv[...], preferred_element_type=f32) + bv[...]     # (TB, W)

    # Broadcast each batch row's query over its N tokens via the replication matrix (MXU).
    q_rep = jnp.dot(R, q, preferred_element_type=f32)                       # (TB*N, W)

    # Per-head scores: reduce head lanes with the scaled one-hot.
    scores_x = jnp.dot(q_rep * k_x, oh, preferred_element_type=f32)         # (TB*N, H)
    scores_s = jnp.dot(q * k_s, oh, preferred_element_type=f32)             # (TB, H)

    # Softmax over the N+1 keys per (batch, head). A single global stabilizer is valid
    # (softmax invariant to per-group constants) and avoids grouped max reductions.
    m = jnp.maximum(jnp.max(scores_x, keepdims=True), jnp.max(scores_s, keepdims=True))  # (1, 1)
    e_x = jnp.exp(scores_x - m)                                             # (TB*N, H)
    e_s = jnp.exp(scores_s - m)                                             # (TB, H)

    # Per-batch denominator = sum over the N token keys (R^T reduce on MXU) + state key.
    denom = lax.dot_general(R, e_x, (((0,), (0,)), ((), ())),
                            preferred_element_type=f32) + e_s               # (TB, H)
    inv_d = pl.reciprocal(denom, approx=True)                               # (TB, H)  (EUP)
    inv_rep = jnp.dot(R, inv_d, preferred_element_type=f32)                 # (TB*N, H)

    # Expand per-head probabilities back to the W lanes of their head and weight the values.
    a_x = jnp.dot(e_x * inv_rep, ohT, preferred_element_type=f32)           # (TB*N, W)
    a_s = jnp.dot(e_s * inv_d, ohT, preferred_element_type=f32)             # (TB, W)

    attn = lax.dot_general(R, a_x * v_x, (((0,), (0,)), ((), ())),
                           preferred_element_type=f32) + a_s * v_s          # (TB, W)

    # ---- MAB epilogue ----
    o = q + attn
    o = _layernorm(o, ln0_g[...], ln0_b[...])
    o = o + jnp.maximum(jnp.dot(o, wo[...], preferred_element_type=f32) + bo[...], 0.0)
    o = _layernorm(o, ln1_g[...], ln1_b[...])

    # ---- SmallSetTransformer residual + FcModule (2x Linear+ReLU) ----
    # TODO(synk): exact FcModule / Tokenizer definitions not provided in the reference source.
    x7 = o + state
    h1 = jnp.maximum(jnp.dot(x7, w_f1[...], preferred_element_type=f32) + b_f1[...], 0.0)
    x8 = jnp.maximum(jnp.dot(h1, w_f2[...], preferred_element_type=f32) + b_f2[...], 0.0)

    out_ref[...] = x8


WEIGHT_NAMES = ['w_tk1', 'b_tk1', 'w_tk2', 'b_tk2',
                'wq', 'bq', 'wk', 'bk', 'wv', 'bv', 'wo', 'bo',
                'ln0_g', 'ln0_b', 'ln1_g', 'ln1_b',
                'w_f1', 'b_f1', 'w_f2', 'b_f2']


def merged_model_forward(s1, s2, params, tile_b=256):
    B, _, s1_dim = s1.shape
    _, N, s2_dim = s2.shape
    W = params['wq'].shape[0]
    H = NUM_HEADS
    assert W % H == 0
    dh = W // H

    # Batch tile: multiple of 8 (sublane), capped at tile_b; pad B up to a tile multiple.
    TB = min(_round_up(tile_b, 8), _round_up(B, 8))
    B_pad = _round_up(B, TB)
    num_tiles = B_pad // TB

    s1_flat = s1.reshape(B, s1_dim)
    s2_flat = s2.reshape(B * N, s2_dim)
    if B_pad != B:
        s1_flat = jnp.pad(s1_flat, ((0, B_pad - B), (0, 0)))
        s2_flat = jnp.pad(s2_flat, ((0, (B_pad - B) * N), (0, 0)))

    # Constant matrices (built once on host, resident in VMEM with constant index maps).
    rep = (jnp.arange(TB * N)[:, None] // N == jnp.arange(TB)[None, :]).astype(jnp.float32)
    head_id = jnp.arange(W) // dh
    onehot = (head_id[:, None] == jnp.arange(H)[None, :]).astype(jnp.float32) * (1.0 / float(np.sqrt(W)))
    onehot_t = (jnp.arange(H)[:, None] == head_id[None, :]).astype(jnp.float32)

    weights = [params[n] for n in WEIGHT_NAMES]
    consts = [rep, onehot, onehot_t] + weights

    in_specs = [
        pl.BlockSpec((TB, s1_dim), lambda t: (t, 0)),
        pl.BlockSpec((TB * N, s2_dim), lambda t: (t, 0)),
    ] + [pl.BlockSpec(c.shape, lambda t: (0, 0)) for c in consts]

    out = pl.pallas_call(
        merged_kernel,
        out_shape=jax.ShapeDtypeStruct((B_pad, W), jnp.float32),
        grid_spec=pltpu.PrefetchScalarGridSpec(
            num_scalar_prefetch=0,
            grid=(num_tiles,),
            in_specs=in_specs,
            out_specs=pl.BlockSpec((TB, W), lambda t: (t, 0)),
        ),
        compiler_params=pltpu.CompilerParams(
            dimension_semantics=("parallel",),
            vmem_limit_bytes=48 * 1024 * 1024),
    )(s1_flat, s2_flat, *consts)
    return out[:B]


# ---------------- pure-JAX reference for verification ----------------
def ref_forward(s1, s2, p):
    W = p['wq'].shape[0]
    H, dh = NUM_HEADS, W // NUM_HEADS
    B = s1.shape[0]
    state = jax.nn.relu(jnp.einsum('bts,sw->btw', s1, p['w_tk1']) + p['b_tk1'])[:, 0, :]
    xt = jax.nn.relu(jnp.einsum('bns,sw->bnw', s2, p['w_tk2']) + p['b_tk2'])
    state2 = state[:, None, :]
    kv = jnp.concatenate([xt, state2], axis=1)
    q = state2 @ p['wq'] + p['bq']
    k = kv @ p['wk'] + p['bk']
    v = kv @ p['wv'] + p['bv']
    qh = q.reshape(B, 1, H, dh)
    kh = k.reshape(B, -1, H, dh)
    vh = v.reshape(B, -1, H, dh)
    scores = jnp.einsum('bqhd,bkhd->bhqk', qh, kh) / jnp.sqrt(jnp.float32(W))
    a = jax.nn.softmax(scores, axis=-1)
    att = jnp.einsum('bhqk,bkhd->bqhd', a, vh).reshape(B, 1, W)
    o = q + att
    o = _layernorm(o, p['ln0_g'], p['ln0_b'])
    o = o + jax.nn.relu(o @ p['wo'] + p['bo'])
    o = _layernorm(o, p['ln1_g'], p['ln1_b'])
    x7 = o[:, 0, :] + state
    h1 = jax.nn.relu(x7 @ p['w_f1'] + p['b_f1'])
    x8 = jax.nn.relu(h1 @ p['w_f2'] + p['b_f2'])
    return x8


def init_params(key, s1_dim, s2_dim, W):
    keys = jax.random.split(key, 8)

    def lin(k, din, dout):
        kw, kb = jax.random.split(k)
        s = 1.0 / np.sqrt(din)
        w = jax.random.uniform(kw, (din, dout), jnp.float32, -s, s)
        b = jax.random.uniform(kb, (1, dout), jnp.float32, -s, s)
        return w, b

    p = {}
    p['w_tk1'], p['b_tk1'] = lin(keys[0], s1_dim, W)
    p['w_tk2'], p['b_tk2'] = lin(keys[1], s2_dim, W)
    p['wq'], p['bq'] = lin(keys[2], W, W)
    p['wk'], p['bk'] = lin(keys[3], W, W)
    p['wv'], p['bv'] = lin(keys[4], W, W)
    p['wo'], p['bo'] = lin(keys[5], W, W)
    p['ln0_g'] = jnp.ones((1, W), jnp.float32)
    p['ln0_b'] = jnp.zeros((1, W), jnp.float32)
    p['ln1_g'] = jnp.ones((1, W), jnp.float32)
    p['ln1_b'] = jnp.zeros((1, W), jnp.float32)
    p['w_f1'], p['b_f1'] = lin(keys[6], W, W)
    p['w_f2'], p['b_f2'] = lin(keys[7], W, W)
    return p


if __name__ == "__main__":
    B, N, S1_DIM, S2_DIM, W = 2, 8, 8, 7, 32  # W divisible by num_heads=4

    key = jax.random.PRNGKey(0)
    k1, k2, kp = jax.random.split(key, 3)
    s1 = jax.random.normal(k1, (B, 1, S1_DIM), jnp.float32)
    s2 = jax.random.normal(k2, (B, N, S2_DIM), jnp.float32)
    params = init_params(kp, S1_DIM, S2_DIM, W)

    out = jax.block_until_ready(merged_model_forward(s1, s2, params))
    assert out.shape == (B, W)
    ref = jax.block_until_ready(ref_forward(s1, s2, params))
    if not np.allclose(np.asarray(out), np.asarray(ref), rtol=2e-3, atol=2e-3):
        raise AssertionError("Pallas kernel does not match pure-JAX reference (single tile)")

    # Exercise the multi-tile grid + batch-padding path.
    B2 = 20
    kk1, kk2 = jax.random.split(jax.random.PRNGKey(1))
    s1b = jax.random.normal(kk1, (B2, 1, S1_DIM), jnp.float32)
    s2b = jax.random.normal(kk2, (B2, N, S2_DIM), jnp.float32)
    out2 = jax.block_until_ready(merged_model_forward(s1b, s2b, params, tile_b=8))
    ref2 = jax.block_until_ready(ref_forward(s1b, s2b, params))
    if not np.allclose(np.asarray(out2), np.asarray(ref2), rtol=2e-3, atol=2e-3):
        raise AssertionError("Pallas kernel does not match pure-JAX reference (multi-tile)")

    print("KERNEL_OK")
</pallas_src>

<mosaic_0001>
module attributes {stable_mosaic.version = 11 : i64} {
  func.func @merged_kernel(%arg0: i32, %arg1: memref<8x8xf32, #tpu.memory_space<vmem>>, %arg2: memref<64x7xf32, #tpu.memory_space<vmem>>, %arg3: memref<64x8xf32, #tpu.memory_space<vmem>>, %arg4: memref<32x4xf32, #tpu.memory_space<vmem>>, %arg5: memref<4x32xf32, #tpu.memory_space<vmem>>, %arg6: memref<8x32xf32, #tpu.memory_space<vmem>>, %arg7: memref<1x32xf32, #tpu.memory_space<vmem>>, %arg8: memref<7x32xf32, #tpu.memory_space<vmem>>, %arg9: memref<1x32xf32, #tpu.memory_space<vmem>>, %arg10: memref<32x32xf32, #tpu.memory_space<vmem>>, %arg11: memref<1x32xf32, #tpu.memory_space<vmem>>, %arg12: memref<32x32xf32, #tpu.memory_space<vmem>>, %arg13: memref<1x32xf32, #tpu.memory_space<vmem>>, %arg14: memref<32x32xf32, #tpu.memory_space<vmem>>, %arg15: memref<1x32xf32, #tpu.memory_space<vmem>>, %arg16: memref<32x32xf32, #tpu.memory_space<vmem>>, %arg17: memref<1x32xf32, #tpu.memory_space<vmem>>, %arg18: memref<1x32xf32, #tpu.memory_space<vmem>>, %arg19: memref<1x32xf32, #tpu.memory_space<vmem>>, %arg20: memref<1x32xf32, #tpu.memory_space<vmem>>, %arg21: memref<1x32xf32, #tpu.memory_space<vmem>>, %arg22: memref<32x32xf32, #tpu.memory_space<vmem>>, %arg23: memref<1x32xf32, #tpu.memory_space<vmem>>, %arg24: memref<32x32xf32, #tpu.memory_space<vmem>>, %arg25: memref<1x32xf32, #tpu.memory_space<vmem>>, %arg26: memref<8x32xf32, #tpu.memory_space<vmem>>) attributes {dimension_semantics = [#tpu.dimension_semantics<parallel>], iteration_bounds = array<i64: 1>, scalar_prefetch = 0 : i64, scratch_operands = 0 : i64, tpu.core_type = #tpu.core_type<tc>, window_params = [{transform_indices = @transform_0, window_bounds = array<i64: 8, 8>}, {transform_indices = @transform_1, window_bounds = array<i64: 64, 7>}, {pipeline_mode = #tpu.pipeline_mode<synchronous>, transform_indices = @transform_2, window_bounds = array<i64: 64, 8>}, {pipeline_mode = #tpu.pipeline_mode<synchronous>, transform_indices = @transform_3, window_bounds = array<i64: 32, 4>}, {pipeline_mode = #tpu.pipeline_mode<synchronous>, transform_indices = @transform_4, window_bounds = array<i64: 4, 32>}, {pipeline_mode = #tpu.pipeline_mode<synchronous>, transform_indices = @transform_5, window_bounds = array<i64: 8, 32>}, {pipeline_mode = #tpu.pipeline_mode<synchronous>, transform_indices = @transform_6, window_bounds = array<i64: 1, 32>}, {pipeline_mode = #tpu.pipeline_mode<synchronous>, transform_indices = @transform_7, window_bounds = array<i64: 7, 32>}, {pipeline_mode = #tpu.pipeline_mode<synchronous>, transform_indices = @transform_8, window_bounds = array<i64: 1, 32>}, {pipeline_mode = #tpu.pipeline_mode<synchronous>, transform_indices = @transform_9, window_bounds = array<i64: 32, 32>}, {pipeline_mode = #tpu.pipeline_mode<synchronous>, transform_indices = @transform_10, window_bounds = array<i64: 1, 32>}, {pipeline_mode = #tpu.pipeline_mode<synchronous>, transform_indices = @transform_11, window_bounds = array<i64: 32, 32>}, {pipeline_mode = #tpu.pipeline_mode<synchronous>, transform_indices = @transform_12, window_bounds = array<i64: 1, 32>}, {pipeline_mode = #tpu.pipeline_mode<synchronous>, transform_indices = @transform_13, window_bounds = array<i64: 32, 32>}, {pipeline_mode = #tpu.pipeline_mode<synchronous>, transform_indices = @transform_14, window_bounds = array<i64: 1, 32>}, {pipeline_mode = #tpu.pipeline_mode<synchronous>, transform_indices = @transform_15, window_bounds = array<i64: 32, 32>}, {pipeline_mode = #tpu.pipeline_mode<synchronous>, transform_indices = @transform_16, window_bounds = array<i64: 1, 32>}, {pipeline_mode = #tpu.pipeline_mode<synchronous>, transform_indices = @transform_17, window_bounds = array<i64: 1, 32>}, {pipeline_mode = #tpu.pipeline_mode<synchronous>, transform_indices = @transform_18, window_bounds = array<i64: 1, 32>}, {pipeline_mode = #tpu.pipeline_mode<synchronous>, transform_indices = @transform_19, window_bounds = array<i64: 1, 32>}, {pipeline_mode = #tpu.pipeline_mode<synchronous>, transform_indices = @transform_20, window_bounds = array<i64: 1, 32>}, {pipeline_mode = #tpu.pipeline_mode<synchronous>, transform_indices = @transform_21, window_bounds = array<i64: 32, 32>}, {pipeline_mode = #tpu.pipeline_mode<synchronous>, transform_indices = @transform_22, window_bounds = array<i64: 1, 32>}, {pipeline_mode = #tpu.pipeline_mode<synchronous>, transform_indices = @transform_23, window_bounds = array<i64: 32, 32>}, {pipeline_mode = #tpu.pipeline_mode<synchronous>, transform_indices = @transform_24, window_bounds = array<i64: 1, 32>}, {transform_indices = @transform_25, window_bounds = array<i64: 8, 32>}]} {
    %c0 = arith.constant 0 : index
    %c0_0 = arith.constant 0 : index
    %0 = vector.load %arg1[%c0, %c0_0] : memref<8x8xf32, #tpu.memory_space<vmem>>, vector<8x8xf32>
    %c0_1 = arith.constant 0 : index
    %c0_2 = arith.constant 0 : index
    %1 = vector.load %arg2[%c0_1, %c0_2] : memref<64x7xf32, #tpu.memory_space<vmem>>, vector<64x7xf32>
    %c0_3 = arith.constant 0 : index
    %c0_4 = arith.constant 0 : index
    %2 = vector.load %arg3[%c0_3, %c0_4] : memref<64x8xf32, #tpu.memory_space<vmem>>, vector<64x8xf32>
    %c0_5 = arith.constant 0 : index
    %c0_6 = arith.constant 0 : index
    %3 = vector.load %arg4[%c0_5, %c0_6] : memref<32x4xf32, #tpu.memory_space<vmem>>, vector<32x4xf32>
    %c0_7 = arith.constant 0 : index
    %c0_8 = arith.constant 0 : index
    %4 = vector.load %arg5[%c0_7, %c0_8] : memref<4x32xf32, #tpu.memory_space<vmem>>, vector<4x32xf32>
    %c0_9 = arith.constant 0 : index
    %c0_10 = arith.constant 0 : index
    %5 = vector.load %arg6[%c0_9, %c0_10] : memref<8x32xf32, #tpu.memory_space<vmem>>, vector<8x32xf32>
    %cst = arith.constant dense<0.000000e+00> : vector<8x32xf32>
    %6 = tpu.matmul %0, %5, %cst {dimension_numbers = #tpu.dot_dimension_numbers<[1], [0], [0], [1], [0, 0, 1, 1], [], []>} : vector<8x8xf32>, vector<8x32xf32>, vector<8x32xf32> -> vector<8x32xf32>
    %c0_11 = arith.constant 0 : index
    %c0_12 = arith.constant 0 : index
    %7 = vector.load %arg7[%c0_11, %c0_12] : memref<1x32xf32, #tpu.memory_space<vmem>>, vector<1x32xf32>
    %8 = vector.broadcast %7 : vector<1x32xf32> to vector<8x32xf32>
    %9 = arith.addf %6, %8 : vector<8x32xf32>
    %cst_13 = arith.constant 0.000000e+00 : f32
    %10 = vector.broadcast %cst_13 : f32 to vector<8x32xf32>
    %11 = arith.maximumf %9, %10 : vector<8x32xf32>
    %c0_14 = arith.constant 0 : index
    %c0_15 = arith.constant 0 : index
    %12 = vector.load %arg8[%c0_14, %c0_15] : memref<7x32xf32, #tpu.memory_space<vmem>>, vector<7x32xf32>
    %cst_16 = arith.constant dense<0.000000e+00> : vector<64x32xf32>
    %13 = tpu.matmul %1, %12, %cst_16 {dimension_numbers = #tpu.dot_dimension_numbers<[1], [0], [0], [1], [0, 0, 1, 1], [], []>} : vector<64x7xf32>, vector<7x32xf32>, vector<64x32xf32> -> vector<64x32xf32>
    %c0_17 = arith.constant 0 : index
    %c0_18 = arith.constant 0 : index
    %14 = vector.load %arg9[%c0_17, %c0_18] : memref<1x32xf32, #tpu.memory_space<vmem>>, vector<1x32xf32>
    %15 = vector.broadcast %14 : vector<1x32xf32> to vector<64x32xf32>
    %16 = arith.addf %13, %15 : vector<64x32xf32>
    %cst_19 = arith.constant 0.000000e+00 : f32
    %17 = vector.broadcast %cst_19 : f32 to vector<64x32xf32>
    %18 = arith.maximumf %16, %17 : vector<64x32xf32>
    %c0_20 = arith.constant 0 : index
    %c0_21 = arith.constant 0 : index
    %19 = vector.load %arg10[%c0_20, %c0_21] : memref<32x32xf32, #tpu.memory_space<vmem>>, vector<32x32xf32>
    %cst_22 = arith.constant dense<0.000000e+00> : vector<8x32xf32>
    %20 = tpu.matmul %11, %19, %cst_22 {dimension_numbers = #tpu.dot_dimension_numbers<[1], [0], [0], [1], [0, 0, 1, 1], [], []>} : vector<8x32xf32>, vector<32x32xf32>, vector<8x32xf32> -> vector<8x32xf32>
    %c0_23 = arith.constant 0 : index
    %c0_24 = arith.constant 0 : index
    %21 = vector.load %arg11[%c0_23, %c0_24] : memref<1x32xf32, #tpu.memory_space<vmem>>, vector<1x32xf32>
    %22 = vector.broadcast %21 : vector<1x32xf32> to vector<8x32xf32>
    %23 = arith.addf %20, %22 : vector<8x32xf32>
    %c0_25 = arith.constant 0 : index
    %c0_26 = arith.constant 0 : index
    %24 = vector.load %arg12[%c0_25, %c0_26] : memref<32x32xf32, #tpu.memory_space<vmem>>, vector<32x32xf32>
    %cst_27 = arith.constant dense<0.000000e+00> : vector<64x32xf32>
    %25 = tpu.matmul %18, %24, %cst_27 {dimension_numbers = #tpu.dot_dimension_numbers<[1], [0], [0], [1], [0, 0, 1, 1], [], []>} : vector<64x32xf32>, vector<32x32xf32>, vector<64x32xf32> -> vector<64x32xf32>
    %c0_28 = arith.constant 0 : index
    %c0_29 = arith.constant 0 : index
    %26 = vector.load %arg13[%c0_28, %c0_29] : memref<1x32xf32, #tpu.memory_space<vmem>>, vector<1x32xf32>
    %27 = vector.broadcast %26 : vector<1x32xf32> to vector<64x32xf32>
    %28 = arith.addf %25, %27 : vector<64x32xf32>
    %c0_30 = arith.constant 0 : index
    %c0_31 = arith.constant 0 : index
    %29 = vector.load %arg14[%c0_30, %c0_31] : memref<32x32xf32, #tpu.memory_space<vmem>>, vector<32x32xf32>
    %cst_32 = arith.constant dense<0.000000e+00> : vector<64x32xf32>
    %30 = tpu.matmul %18, %29, %cst_32 {dimension_numbers = #tpu.dot_dimension_numbers<[1], [0], [0], [1], [0, 0, 1, 1], [], []>} : vector<64x32xf32>, vector<32x32xf32>, vector<64x32xf32> -> vector<64x32xf32>
    %c0_33 = arith.constant 0 : index
    %c0_34 = arith.constant 0 : index
    %31 = vector.load %arg15[%c0_33, %c0_34] : memref<1x32xf32, #tpu.memory_space<vmem>>, vector<1x32xf32>
    %32 = vector.broadcast %31 : vector<1x32xf32> to vector<64x32xf32>
    %33 = arith.addf %30, %32 : vector<64x32xf32>
    %c0_35 = arith.constant 0 : index
    %c0_36 = arith.constant 0 : index
    %34 = vector.load %arg12[%c0_35, %c0_36] : memref<32x32xf32, #tpu.memory_space<vmem>>, vector<32x32xf32>
    %cst_37 = arith.constant dense<0.000000e+00> : vector<8x32xf32>
    %35 = tpu.matmul %11, %34, %cst_37 {dimension_numbers = #tpu.dot_dimension_numbers<[1], [0], [0], [1], [0, 0, 1, 1], [], []>} : vector<8x32xf32>, vector<32x32xf32>, vector<8x32xf32> -> vector<8x32xf32>
    %c0_38 = arith.constant 0 : index
    %c0_39 = arith.constant 0 : index
    %36 = vector.load %arg13[%c0_38, %c0_39] : memref<1x32xf32, #tpu.memory_space<vmem>>, vector<1x32xf32>
    %37 = vector.broadcast %36 : vector<1x32xf32> to vector<8x32xf32>
    %38 = arith.addf %35, %37 : vector<8x32xf32>
    %c0_40 = arith.constant 0 : index
    %c0_41 = arith.constant 0 : index
    %39 = vector.load %arg14[%c0_40, %c0_41] : memref<32x32xf32, #tpu.memory_space<vmem>>, vector<32x32xf32>
    %cst_42 = arith.constant dense<0.000000e+00> : vector<8x32xf32>
    %40 = tpu.matmul %11, %39, %cst_42 {dimension_numbers = #tpu.dot_dimension_numbers<[1], [0], [0], [1], [0, 0, 1, 1], [], []>} : vector<8x32xf32>, vector<32x32xf32>, vector<8x32xf32> -> vector<8x32xf32>
    %c0_43 = arith.constant 0 : index
    %c0_44 = arith.constant 0 : index
    %41 = vector.load %arg15[%c0_43, %c0_44] : memref<1x32xf32, #tpu.memory_space<vmem>>, vector<1x32xf32>
    %42 = vector.broadcast %41 : vector<1x32xf32> to vector<8x32xf32>
    %43 = arith.addf %40, %42 : vector<8x32xf32>
    %cst_45 = arith.constant dense<0.000000e+00> : vector<64x32xf32>
    %44 = tpu.matmul %2, %23, %cst_45 {dimension_numbers = #tpu.dot_dimension_numbers<[1], [0], [0], [1], [0, 0, 1, 1], [], []>} : vector<64x8xf32>, vector<8x32xf32>, vector<64x32xf32> -> vector<64x32xf32>
    %45 = arith.mulf %44, %28 : vector<64x32xf32>
    %cst_46 = arith.constant dense<0.000000e+00> : vector<64x4xf32>
    %46 = tpu.matmul %45, %3, %cst_46 {dimension_numbers = #tpu.dot_dimension_numbers<[1], [0], [0], [1], [0, 0, 1, 1], [], []>} : vector<64x32xf32>, vector<32x4xf32>, vector<64x4xf32> -> vector<64x4xf32>
    %47 = arith.mulf %23, %38 : vector<8x32xf32>
    %cst_47 = arith.constant dense<0.000000e+00> : vector<8x4xf32>
    %48 = tpu.matmul %47, %3, %cst_47 {dimension_numbers = #tpu.dot_dimension_numbers<[1], [0], [0], [1], [0, 0, 1, 1], [], []>} : vector<8x32xf32>, vector<32x4xf32>, vector<8x4xf32> -> vector<8x4xf32>
    %49 = vector.shape_cast %46 : vector<64x4xf32> to vector<1x64x4xf32>
    %cst_48 = arith.constant dense<0xFF800000> : vector<1xf32>
    %50 = vector.multi_reduction <maximumf>, %49, %cst_48 [1, 2] : vector<1x64x4xf32> to vector<1xf32>
    %51 = vector.shape_cast %50 : vector<1xf32> to vector<1x1x1xf32>
    %52 = vector.extract %51[0, 0, 0] : f32 from vector<1x1x1xf32>
    %53 = vector.broadcast %52 : f32 to vector<1x1xf32>
    %54 = vector.shape_cast %48 : vector<8x4xf32> to vector<1x8x4xf32>
    %cst_49 = arith.constant dense<0xFF800000> : vector<1xf32>
    %55 = vector.multi_reduction <maximumf>, %54, %cst_49 [1, 2] : vector<1x8x4xf32> to vector<1xf32>
    %56 = vector.shape_cast %55 : vector<1xf32> to vector<1x1x1xf32>
    %57 = vector.extract %56[0, 0, 0] : f32 from vector<1x1x1xf32>
    %58 = vector.broadcast %57 : f32 to vector<1x1xf32>
    %59 = arith.maximumf %53, %58 : vector<1x1xf32>
    %60 = vector.broadcast %59 : vector<1x1xf32> to vector<64x4xf32>
    %61 = arith.subf %46, %60 : vector<64x4xf32>
    %62 = math.exp %61 : vector<64x4xf32>
    %63 = vector.broadcast %59 : vector<1x1xf32> to vector<8x4xf32>
    %64 = arith.subf %48, %63 : vector<8x4xf32>
    %65 = math.exp %64 : vector<8x4xf32>
    %cst_50 = arith.constant dense<0.000000e+00> : vector<8x4xf32>
    %66 = tpu.matmul %2, %62, %cst_50 {dimension_numbers = #tpu.dot_dimension_numbers<[0], [0], [1], [1], [0, 1, 1, 1], [], []>} : vector<64x8xf32>, vector<64x4xf32>, vector<8x4xf32> -> vector<8x4xf32>
    %67 = arith.addf %66, %65 : vector<8x4xf32>
    %68 = tpu.reciprocal %67 {approx = true} : vector<8x4xf32> -> vector<8x4xf32>
    %cst_51 = arith.constant dense<0.000000e+00> : vector<64x4xf32>
    %69 = tpu.matmul %2, %68, %cst_51 {dimension_numbers = #tpu.dot_dimension_numbers<[1], [0], [0], [1], [0, 0, 1, 1], [], []>} : vector<64x8xf32>, vector<8x4xf32>, vector<64x4xf32> -> vector<64x4xf32>
    %70 = arith.mulf %62, %69 : vector<64x4xf32>
    %cst_52 = arith.constant dense<0.000000e+00> : vector<64x32xf32>
    %71 = tpu.matmul %70, %4, %cst_52 {dimension_numbers = #tpu.dot_dimension_numbers<[1], [0], [0], [1], [0, 0, 1, 1], [], []>} : vector<64x4xf32>, vector<4x32xf32>, vector<64x32xf32> -> vector<64x32xf32>
    %72 = arith.mulf %65, %68 : vector<8x4xf32>
    %cst_53 = arith.constant dense<0.000000e+00> : vector<8x32xf32>
    %73 = tpu.matmul %72, %4, %cst_53 {dimension_numbers = #tpu.dot_dimension_numbers<[1], [0], [0], [1], [0, 0, 1, 1], [], []>} : vector<8x4xf32>, vector<4x32xf32>, vector<8x32xf32> -> vector<8x32xf32>
    %74 = arith.mulf %71, %33 : vector<64x32xf32>
    %cst_54 = arith.constant dense<0.000000e+00> : vector<8x32xf32>
    %75 = tpu.matmul %2, %74, %cst_54 {dimension_numbers = #tpu.dot_dimension_numbers<[0], [0], [1], [1], [0, 1, 1, 1], [], []>} : vector<64x8xf32>, vector<64x32xf32>, vector<8x32xf32> -> vector<8x32xf32>
    %76 = arith.mulf %73, %43 : vector<8x32xf32>
    %77 = arith.addf %75, %76 : vector<8x32xf32>
    %78 = arith.addf %23, %77 : vector<8x32xf32>
    %c0_55 = arith.constant 0 : index
    %c0_56 = arith.constant 0 : index
    %79 = vector.load %arg18[%c0_55, %c0_56] : memref<1x32xf32, #tpu.memory_space<vmem>>, vector<1x32xf32>
    %c0_57 = arith.constant 0 : index
    %c0_58 = arith.constant 0 : index
    %80 = vector.load %arg19[%c0_57, %c0_58] : memref<1x32xf32, #tpu.memory_space<vmem>>, vector<1x32xf32>
    %cst_59 = arith.constant dense<0.000000e+00> : vector<8xf32>
    %81 = vector.multi_reduction <add>, %78, %cst_59 [1] : vector<8x32xf32> to vector<8xf32>
    %82 = vector.shape_cast %81 : vector<8xf32> to vector<8x1xf32>
    %cst_60 = arith.constant 3.200000e+01 : f32
    %83 = vector.broadcast %cst_60 : f32 to vector<8x1xf32>
    %84 = arith.divf %82, %83 : vector<8x1xf32>
    %85 = vector.broadcast %84 : vector<8x1xf32> to vector<8x32xf32>
    %86 = arith.subf %78, %85 : vector<8x32xf32>
    %87 = arith.mulf %86, %86 : vector<8x32xf32>
    %cst_61 = arith.constant dense<0.000000e+00> : vector<8xf32>
    %88 = vector.multi_reduction <add>, %87, %cst_61 [1] : vector<8x32xf32> to vector<8xf32>
    %89 = vector.shape_cast %88 : vector<8xf32> to vector<8x1xf32>
    %cst_62 = arith.constant 3.200000e+01 : f32
    %90 = vector.broadcast %cst_62 : f32 to vector<8x1xf32>
    %91 = arith.divf %89, %90 : vector<8x1xf32>
    %92 = vector.broadcast %84 : vector<8x1xf32> to vector<8x32xf32>
    %93 = arith.subf %78, %92 : vector<8x32xf32>
    %cst_63 = arith.constant 9.99999974E-6 : f32
    %94 = vector.broadcast %cst_63 : f32 to vector<8x1xf32>
    %95 = arith.addf %91, %94 : vector<8x1xf32>
    %96 = math.rsqrt %95 : vector<8x1xf32>
    %97 = vector.broadcast %96 : vector<8x1xf32> to vector<8x32xf32>
    %98 = arith.mulf %93, %97 : vector<8x32xf32>
    %99 = vector.broadcast %79 : vector<1x32xf32> to vector<8x32xf32>
    %100 = arith.mulf %98, %99 : vector<8x32xf32>
    %101 = vector.broadcast %80 : vector<1x32xf32> to vector<8x32xf32>
    %102 = arith.addf %100, %101 : vector<8x32xf32>
    %c0_64 = arith.constant 0 : index
    %c0_65 = arith.constant 0 : index
    %103 = vector.load %arg16[%c0_64, %c0_65] : memref<32x32xf32, #tpu.memory_space<vmem>>, vector<32x32xf32>
    %cst_66 = arith.constant dense<0.000000e+00> : vector<8x32xf32>
    %104 = tpu.matmul %102, %103, %cst_66 {dimension_numbers = #tpu.dot_dimension_numbers<[1], [0], [0], [1], [0, 0, 1, 1], [], []>} : vector<8x32xf32>, vector<32x32xf32>, vector<8x32xf32> -> vector<8x32xf32>
    %c0_67 = arith.constant 0 : index
    %c0_68 = arith.constant 0 : index
    %105 = vector.load %arg17[%c0_67, %c0_68] : memref<1x32xf32, #tpu.memory_space<vmem>>, vector<1x32xf32>
    %106 = vector.broadcast %105 : vector<1x32xf32> to vector<8x32xf32>
    %107 = arith.addf %104, %106 : vector<8x32xf32>
    %cst_69 = arith.constant 0.000000e+00 : f32
    %108 = vector.broadcast %cst_69 : f32 to vector<8x32xf32>
    %109 = arith.maximumf %107, %108 : vector<8x32xf32>
    %110 = arith.addf %102, %109 : vector<8x32xf32>
    %c0_70 = arith.constant 0 : index
    %c0_71 = arith.constant 0 : index
    %111 = vector.load %arg20[%c0_70, %c0_71] : memref<1x32xf32, #tpu.memory_space<vmem>>, vector<1x32xf32>
    %c0_72 = arith.constant 0 : index
    %c0_73 = arith.constant 0 : index
    %112 = vector.load %arg21[%c0_72, %c0_73] : memref<1x32xf32, #tpu.memory_space<vmem>>, vector<1x32xf32>
    %cst_74 = arith.constant dense<0.000000e+00> : vector<8xf32>
    %113 = vector.multi_reduction <add>, %110, %cst_74 [1] : vector<8x32xf32> to vector<8xf32>
    %114 = vector.shape_cast %113 : vector<8xf32> to vector<8x1xf32>
    %cst_75 = arith.constant 3.200000e+01 : f32
    %115 = vector.broadcast %cst_75 : f32 to vector<8x1xf32>
    %116 = arith.divf %114, %115 : vector<8x1xf32>
    %117 = vector.broadcast %116 : vector<8x1xf32> to vector<8x32xf32>
    %118 = arith.subf %110, %117 : vector<8x32xf32>
    %119 = arith.mulf %118, %118 : vector<8x32xf32>
    %cst_76 = arith.constant dense<0.000000e+00> : vector<8xf32>
    %120 = vector.multi_reduction <add>, %119, %cst_76 [1] : vector<8x32xf32> to vector<8xf32>
    %121 = vector.shape_cast %120 : vector<8xf32> to vector<8x1xf32>
    %cst_77 = arith.constant 3.200000e+01 : f32
    %122 = vector.broadcast %cst_77 : f32 to vector<8x1xf32>
    %123 = arith.divf %121, %122 : vector<8x1xf32>
    %124 = vector.broadcast %116 : vector<8x1xf32> to vector<8x32xf32>
    %125 = arith.subf %110, %124 : vector<8x32xf32>
    %cst_78 = arith.constant 9.99999974E-6 : f32
    %126 = vector.broadcast %cst_78 : f32 to vector<8x1xf32>
    %127 = arith.addf %123, %126 : vector<8x1xf32>
    %128 = math.rsqrt %127 : vector<8x1xf32>
    %129 = vector.broadcast %128 : vector<8x1xf32> to vector<8x32xf32>
    %130 = arith.mulf %125, %129 : vector<8x32xf32>
    %131 = vector.broadcast %111 : vector<1x32xf32> to vector<8x32xf32>
    %132 = arith.mulf %130, %131 : vector<8x32xf32>
    %133 = vector.broadcast %112 : vector<1x32xf32> to vector<8x32xf32>
    %134 = arith.addf %132, %133 : vector<8x32xf32>
    %135 = arith.addf %134, %11 : vector<8x32xf32>
    %c0_79 = arith.constant 0 : index
    %c0_80 = arith.constant 0 : index
    %136 = vector.load %arg22[%c0_79, %c0_80] : memref<32x32xf32, #tpu.memory_space<vmem>>, vector<32x32xf32>
    %cst_81 = arith.constant dense<0.000000e+00> : vector<8x32xf32>
    %137 = tpu.matmul %135, %136, %cst_81 {dimension_numbers = #tpu.dot_dimension_numbers<[1], [0], [0], [1], [0, 0, 1, 1], [], []>} : vector<8x32xf32>, vector<32x32xf32>, vector<8x32xf32> -> vector<8x32xf32>
    %c0_82 = arith.constant 0 : index
    %c0_83 = arith.constant 0 : index
    %138 = vector.load %arg23[%c0_82, %c0_83] : memref<1x32xf32, #tpu.memory_space<vmem>>, vector<1x32xf32>
    %139 = vector.broadcast %138 : vector<1x32xf32> to vector<8x32xf32>
    %140 = arith.addf %137, %139 : vector<8x32xf32>
    %cst_84 = arith.constant 0.000000e+00 : f32
    %141 = vector.broadcast %cst_84 : f32 to vector<8x32xf32>
    %142 = arith.maximumf %140, %141 : vector<8x32xf32>
    %c0_85 = arith.constant 0 : index
    %c0_86 = arith.constant 0 : index
    %143 = vector.load %arg24[%c0_85, %c0_86] : memref<32x32xf32, #tpu.memory_space<vmem>>, vector<32x32xf32>
    %cst_87 = arith.constant dense<0.000000e+00> : vector<8x32xf32>
    %144 = tpu.matmul %142, %143, %cst_87 {dimension_numbers = #tpu.dot_dimension_numbers<[1], [0], [0], [1], [0, 0, 1, 1], [], []>} : vector<8x32xf32>, vector<32x32xf32>, vector<8x32xf32> -> vector<8x32xf32>
    %c0_88 = arith.constant 0 : index
    %c0_89 = arith.constant 0 : index
    %145 = vector.load %arg25[%c0_88, %c0_89] : memref<1x32xf32, #tpu.memory_space<vmem>>, vector<1x32xf32>
    %146 = vector.broadcast %145 : vector<1x32xf32> to vector<8x32xf32>
    %147 = arith.addf %144, %146 : vector<8x32xf32>
    %cst_90 = arith.constant 0.000000e+00 : f32
    %148 = vector.broadcast %cst_90 : f32 to vector<8x32xf32>
    %149 = arith.maximumf %147, %148 : vector<8x32xf32>
    %c0_91 = arith.constant 0 : index
    %c0_92 = arith.constant 0 : index
    %150 = vector.load %arg26[%c0_91, %c0_92] : memref<8x32xf32, #tpu.memory_space<vmem>>, vector<8x32xf32>
    tpu.vector_store %arg26[%c0_91, %c0_92], %149 {strides = array<i32>} : memref<8x32xf32, #tpu.memory_space<vmem>>, vector<8x32xf32>,
    return
  }
  func.func @transform_0(%arg0: i32) -> (i32, i32) {
    %c0_i32 = arith.constant 0 : i32
    %c0_i32_0 = arith.constant 0 : i32
    return %arg0, %c0_i32 : i32, i32
  }
  func.func @transform_1(%arg0: i32) -> (i32, i32) {
    %c0_i32 = arith.constant 0 : i32
    %c0_i32_0 = arith.constant 0 : i32
    return %arg0, %c0_i32 : i32, i32
  }
  func.func @transform_2(%arg0: i32) -> (i32, i32) {
    %c0_i32 = arith.constant 0 : i32
    %c0_i32_0 = arith.constant 0 : i32
    %c0_i32_1 = arith.constant 0 : i32
    return %c0_i32, %c0_i32_0 : i32, i32
  }
  func.func @transform_3(%arg0: i32) -> (i32, i32) {
    %c0_i32 = arith.constant 0 : i32
    %c0_i32_0 = arith.constant 0 : i32
    %c0_i32_1 = arith.constant 0 : i32
    return %c0_i32, %c0_i32_0 : i32, i32
  }
  func.func @transform_4(%arg0: i32) -> (i32, i32) {
    %c0_i32 = arith.constant 0 : i32
    %c0_i32_0 = arith.constant 0 : i32
    %c0_i32_1 = arith.constant 0 : i32
    return %c0_i32, %c0_i32_0 : i32, i32
  }
  func.func @transform_5(%arg0: i32) -> (i32, i32) {
    %c0_i32 = arith.constant 0 : i32
    %c0_i32_0 = arith.constant 0 : i32
    %c0_i32_1 = arith.constant 0 : i32
    return %c0_i32, %c0_i32_0 : i32, i32
  }
  func.func @transform_6(%arg0: i32) -> (i32, i32) {
    %c0_i32 = arith.constant 0 : i32
    %c0_i32_0 = arith.constant 0 : i32
    %c0_i32_1 = arith.constant 0 : i32
    return %c0_i32, %c0_i32_0 : i32, i32
  }
  func.func @transform_7(%arg0: i32) -> (i32, i32) {
    %c0_i32 = arith.constant 0 : i32
    %c0_i32_0 = arith.constant 0 : i32
    %c0_i32_1 = arith.constant 0 : i32
    return %c0_i32, %c0_i32_0 : i32, i32
  }
  func.func @transform_8(%arg0: i32) -> (i32, i32) {
    %c0_i32 = arith.constant 0 : i32
    %c0_i32_0 = arith.constant 0 : i32
    %c0_i32_1 = arith.constant 0 : i32
    return %c0_i32, %c0_i32_0 : i32, i32
  }
  func.func @transform_9(%arg0: i32) -> (i32, i32) {
    %c0_i32 = arith.constant 0 : i32
    %c0_i32_0 = arith.constant 0 : i32
    %c0_i32_1 = arith.constant 0 : i32
    return %c0_i32, %c0_i32_0 : i32, i32
  }
  func.func @transform_10(%arg0: i32) -> (i32, i32) {
    %c0_i32 = arith.constant 0 : i32
    %c0_i32_0 = arith.constant 0 : i32
    %c0_i32_1 = arith.constant 0 : i32
    return %c0_i32, %c0_i32_0 : i32, i32
  }
  func.func @transform_11(%arg0: i32) -> (i32, i32) {
    %c0_i32 = arith.constant 0 : i32
    %c0_i32_0 = arith.constant 0 : i32
    %c0_i32_1 = arith.constant 0 : i32
    return %c0_i32, %c0_i32_0 : i32, i32
  }
  func.func @transform_12(%arg0: i32) -> (i32, i32) {
    %c0_i32 = arith.constant 0 : i32
    %c0_i32_0 = arith.constant 0 : i32
    %c0_i32_1 = arith.constant 0 : i32
    return %c0_i32, %c0_i32_0 : i32, i32
  }
  func.func @transform_13(%arg0: i32) -> (i32, i32) {
    %c0_i32 = arith.constant 0 : i32
    %c0_i32_0 = arith.constant 0 : i32
    %c0_i32_1 = arith.constant 0 : i32
    return %c0_i32, %c0_i32_0 : i32, i32
  }
  func.func @transform_14(%arg0: i32) -> (i32, i32) {
    %c0_i32 = arith.constant 0 : i32
    %c0_i32_0 = arith.constant 0 : i32
    %c0_i32_1 = arith.constant 0 : i32
    return %c0_i32, %c0_i32_0 : i32, i32
  }
  func.func @transform_15(%arg0: i32) -> (i32, i32) {
    %c0_i32 = arith.constant 0 : i32
    %c0_i32_0 = arith.constant 0 : i32
    %c0_i32_1 = arith.constant 0 : i32
    return %c0_i32, %c0_i32_0 : i32, i32
  }
  func.func @transform_16(%arg0: i32) -> (i32, i32) {
    %c0_i32 = arith.constant 0 : i32
    %c0_i32_0 = arith.constant 0 : i32
    %c0_i32_1 = arith.constant 0 : i32
    return %c0_i32, %c0_i32_0 : i32, i32
  }
  func.func @transform_17(%arg0: i32) -> (i32, i32) {
    %c0_i32 = arith.constant 0 : i32
    %c0_i32_0 = arith.constant 0 : i32
    %c0_i32_1 = arith.constant 0 : i32
    return %c0_i32, %c0_i32_0 : i32, i32
  }
  func.func @transform_18(%arg0: i32) -> (i32, i32) {
    %c0_i32 = arith.constant 0 : i32
    %c0_i32_0 = arith.constant 0 : i32
    %c0_i32_1 = arith.constant 0 : i32
    return %c0_i32, %c0_i32_0 : i32, i32
  }
  func.func @transform_19(%arg0: i32) -> (i32, i32) {
    %c0_i32 = arith.constant 0 : i32
    %c0_i32_0 = arith.constant 0 : i32
    %c0_i32_1 = arith.constant 0 : i32
    return %c0_i32, %c0_i32_0 : i32, i32
  }
  func.func @transform_20(%arg0: i32) -> (i32, i32) {
    %c0_i32 = arith.constant 0 : i32
    %c0_i32_0 = arith.constant 0 : i32
    %c0_i32_1 = arith.constant 0 : i32
    return %c0_i32, %c0_i32_0 : i32, i32
  }
  func.func @transform_21(%arg0: i32) -> (i32, i32) {
    %c0_i32 = arith.constant 0 : i32
    %c0_i32_0 = arith.constant 0 : i32
    %c0_i32_1 = arith.constant 0 : i32
    return %c0_i32, %c0_i32_0 : i32, i32
  }
  func.func @transform_22(%arg0: i32) -> (i32, i32) {
    %c0_i32 = arith.constant 0 : i32
    %c0_i32_0 = arith.constant 0 : i32
    %c0_i32_1 = arith.constant 0 : i32
    return %c0_i32, %c0_i32_0 : i32, i32
  }
  func.func @transform_23(%arg0: i32) -> (i32, i32) {
    %c0_i32 = arith.constant 0 : i32
    %c0_i32_0 = arith.constant 0 : i32
    %c0_i32_1 = arith.constant 0 : i32
    return %c0_i32, %c0_i32_0 : i32, i32
  }
  func.func @transform_24(%arg0: i32) -> (i32, i32) {
    %c0_i32 = arith.constant 0 : i32
    %c0_i32_0 = arith.constant 0 : i32
    %c0_i32_1 = arith.constant 0 : i32
    return %c0_i32, %c0_i32_0 : i32, i32
  }
  func.func @transform_25(%arg0: i32) -> (i32, i32) {
    %c0_i32 = arith.constant 0 : i32
    %c0_i32_0 = arith.constant 0 : i32
    return %arg0, %c0_i32 : i32, i32
  }
}

</mosaic_0001>

<bundles_post_ra>
// kernel: tpu_custom_call.1
= control target key start
LH: loop header
LB: loop body
LE: loop exit
PB: predicated region body
PF: predicated region fallthrough
CT: control target
= control target key end

     0   :  { %s3305_s0 = inlined_call_operand.hbm [shape: f32[8,8], index: 0, kind: input, shape index: {}]   ;;  %s3306_s1 = inlined_call_operand.vmem [shape: f32[64,7], index: 1, kind: input, shape index: {}]   ;;  %s3307_s2 = inlined_call_operand.vmem [shape: f32[64,8], index: 2, kind: input, shape index: {}]   ;;  %s3308_s3 = inlined_call_operand.vmem [shape: f32[32,4], index: 3, kind: input, shape index: {}]   ;;  %s3309_s4 = inlined_call_operand.hbm [shape: f32[4,32], index: 4, kind: input, shape index: {}]   ;;  %s3310_s5 = inlined_call_operand.hbm [shape: f32[8,32], index: 5, kind: input, shape index: {}]   ;;  %s3311_s6 = inlined_call_operand.vmem [shape: f32[1,32], index: 6, kind: input, shape index: {}]   ;;  %s3312_s7 = inlined_call_operand.hbm [shape: f32[7,32], index: 7, kind: input, shape index: {}]   ;;  %s3313_s8 = inlined_call_operand.vmem [shape: f32[1,32], index: 8, kind: input, shape index: {}]   ;;  %s3314_s9 = inlined_call_operand.vmem [shape: f32[32,32], index: 9, kind: input, shape index: {}]   ;;  %s3315_s10 = inlined_call_operand.vmem [shape: f32[1,32], index: 10, kind: input, shape index: {}]   ;;  %s3316_s11 = inlined_call_operand.vmem [shape: f32[32,32], index: 11, kind: input, shape index: {}]   ;;  %s3317_s12 = inlined_call_operand.vmem [shape: f32[1,32], index: 12, kind: input, shape index: {}]   ;;  %s3318_s13 = inlined_call_operand.vmem [shape: f32[32,32], index: 13, kind: input, shape index: {}]   ;;  %s3319_s14 = inlined_call_operand.vmem [shape: f32[1,32], index: 14, kind: input, shape index: {}]   ;;  %s3320_s15 = inlined_call_operand.vmem [shape: f32[32,32], index: 15, kind: input, shape index: {}]   ;;  %s3321_s16 = inlined_call_operand.vmem [shape: f32[1,32], index: 16, kind: input, shape index: {}]   ;;  %s3322_s17 = inlined_call_operand.vmem [shape: f32[1,32], index: 17, kind: input, shape index: {}]   ;;  %s3323_s18 = inlined_call_operand.vmem [shape: f32[1,32], index: 18, kind: input, shape index: {}]   ;;  %s3324_s19 = inlined_call_operand.vmem [shape: f32[1,32], index: 19, kind: input, shape index: {}]   ;;  %s3325_s20 = inlined_call_operand.vmem [shape: f32[1,32], index: 20, kind: input, shape index: {}]   ;;  %s3326_s21 = inlined_call_operand.vmem [shape: f32[32,32], index: 21, kind: input, shape index: {}]   ;;  %s3327_s22 = inlined_call_operand.vmem [shape: f32[1,32], index: 22, kind: input, shape index: {}]   ;;  %s3328_s23 = inlined_call_operand.vmem [shape: f32[32,32], index: 23, kind: input, shape index: {}]   ;;  %s3329_s24 = inlined_call_operand.vmem [shape: f32[1,32], index: 24, kind: input, shape index: {}]   ;;  %s3330_s25 = inlined_call_operand.hbm [shape: f32[8,32], index: 25, kind: output, shape index: {}]  }
   0x1   :  { %3335 = sst [smem:[#allocation15_spill]] %s3305_s0 }
   0x2   :  { %3336 = sst [smem:[#allocation16_spill]] %s3306_s1 }
   0x3   :  { %3337 = sst [smem:[#allocation17_spill]] %s3307_s2 }
   0x4   :  { %3338 = sst [smem:[#allocation18_spill]] %s3308_s3 }
   0x5   :  { %3339 = sst [smem:[#allocation19_spill]] %s3309_s4 }
   0x6   :  { %3340 = sst [smem:[#allocation20_spill]] %s3310_s5 }
   0x7   :  { %3341 = sst [smem:[#allocation21_spill]] %s3311_s6 }
   0x8   :  { %3342 = sst [smem:[#allocation22_spill]] %s3312_s7 }
   0x9   :  { %3343 = sst [smem:[#allocation23_spill]] %s3313_s8 }
   0xa   :  { %3344 = sst [smem:[#allocation24_spill]] %s3314_s9 }
   0xb   :  { %30 = vsyncpa [#allocation3], 0 }
   0xc   :  { %31 = vsyncpa [#allocation6], 0 }
   0xd   :  { %32 = vsyncpa [#allocation9], 0 }
   0xe   :  { %33 = vsyncpa [#allocation4], 0  ;;  %s2705_s29 = smov [#allocation5]   ;;  %s2706_s6 = smov [#allocation2]  }
   0xf   :  { %s56_s2 = sshll.u32 %s2705_s29, 4  ;;  %s40_s30 = sshll.u32 %s2706_s6, 4  ;;  %s57_s2 = int_to_ptr.vmem [resolvable:$true] %s56_s2  ;;  %s41_s30 = int_to_ptr.vmem [resolvable:$true] %s40_s30 }
  0x10   :  { %s2605_s7 = scalar_lea.vmem %s57_s2, 64  ;;  %p2610_p1 = scmp.lt.s32.totalorder %s57_s2, %s57_s2 }
  0x11   :  { %p2606_p0 = scmp.ne.s32.totalorder %s57_s2, %s2605_s7  ;;  %p2611_p2 = scmp.lt.s32.totalorder %s2605_s7, %s2605_s7 }
  0x13   :  { %p2612_p3 = por %p2611_p2, %p2610_p1 }
  0x15   :  { %p2613_p4 = pnand %p2612_p3, %p2606_p0 }
  0x17   :  { %2616 = shalt.err (!%p2613_p4)
}
  0x18   :  { %s3345_s1 = sld [smem:[#allocation19_spill]]  ;;  %s2625_s8 = scalar_lea.vmem %s41_s30, 128 }
  0x19   :  { %p2626_p5 = scmp.ne.s32.totalorder %s41_s30, %s2625_s8  ;;  %p2630_p6 = scmp.lt.s32.totalorder %s41_s30, %s41_s30 }
  0x1a   :  { %p2631_p7 = scmp.lt.s32.totalorder %s2625_s8, %s2625_s8 }
  0x1c   :  { %p2632_p8 = por %p2631_p7, %p2630_p6 }
  0x1e   :  { %59 = dma.hbm_to_vmem [thread:$0]  %s3345_s1, 64, %s57_s2, [#allocation6]  }
  0x1f   :  { %p2633_p9 = pnand %p2632_p8, %p2626_p5 }
  0x21   :  { %2636 = shalt.err (!%p2633_p9)
}
  0x22   :  { %s3346_s28 = sld [smem:[#allocation15_spill]]  ;;  %s2707_s9 = smov [#allocation7]  }
  0x23   :  { %s66_s5 = sshll.u32 %s2707_s9, 4  ;;  %s2708_s0 = smov [#allocation8]   ;;  %s67_s5 = int_to_ptr.vmem [resolvable:$true] %s66_s5 }
  0x24   :  { %s78_s29 = sshll.u32 %s2708_s0, 4  ;;  %s2645_s6 = scalar_lea.vmem %s67_s5, 128  ;;  %s79_s29 = int_to_ptr.vmem [resolvable:$true] %s78_s29 }
  0x25   :  { %p2646_p10 = scmp.ne.s32.totalorder %s67_s5, %s2645_s6  ;;  %p2650_p11 = scmp.lt.s32.totalorder %s67_s5, %s67_s5 }
  0x26   :  { %p2651_p12 = scmp.lt.s32.totalorder %s2645_s6, %s2645_s6 }
  0x28   :  { %43 = dma.hbm_to_vmem [thread:$0]  %s3346_s28, 128, %s41_s30, [#allocation3]  }
  0x29   :  { %p2652_p13 = por %p2651_p12, %p2650_p11 }
  0x2b   :  { %p2653_p0 = pnand %p2652_p13, %p2646_p10 }
  0x2d   :  { %2656 = shalt.err (!%p2653_p0)
}
  0x2e   :  { %s3347_s3 = sld [smem:[#allocation20_spill]]  ;;  %s2665_s26 = scalar_lea.vmem %s79_s29, 128 }
  0x2f   :  { %p2666_p1 = scmp.ne.s32.totalorder %s79_s29, %s2665_s26  ;;  %p2670_p2 = scmp.lt.s32.totalorder %s79_s29, %s79_s29 }
  0x30   :  { %p2671_p3 = scmp.lt.s32.totalorder %s2665_s26, %s2665_s26 }
  0x32   :  { %p2672_p4 = por %p2671_p3, %p2670_p2 }
  0x34   :  { %69 = dma.hbm_to_vmem [thread:$0]  %s3347_s3, 128, %s67_s5, [#allocation6]  }
  0x35   :  { %p2673_p5 = pnand %p2672_p4, %p2666_p1 }
  0x37   :  { %2676 = shalt.err (!%p2673_p5)
}
  0x38   :  { %s3348_s8 = sld [smem:[#allocation22_spill]] }
  0x3e   :  { %81 = dma.hbm_to_vmem [thread:$0]  %s3348_s8, 128, %s79_s29, [#allocation9]  }
  0x3f   :  { %2697 = dma.done.wait [#allocation3], 128  }
  0x40   :  { %2698 = vsyncadd [#allocation3], 4294967168 }
  0x41   :  { %2699 = dma.done.wait [#allocation6], 192  }
  0x42   :  { %2700 = vsyncadd [#allocation6], 4294967104 }
  0x43   :  { %2701 = dma.done.wait [#allocation9], 128  }
  0x44   :  { %2702 = vsyncadd [#allocation9], 4294967168  ;;  %v2709_v0 = vmov 0.0   ;;  %vm2710_vm0 = vmmov 0   ;;  %vm266_vm1 = vcmask 1046528   ;;  %vm158_vm2 = vcmask 64512  }
  0x45   :  { %2321 = vmatprep.subr.mxu0 %v2709_v0  ;;  %2323 = vmatprep.mubr.msk.f32.mxu0 %vm2710_vm0, %v2709_v0  ;;  %v150_v1 = vld [vmem:[#allocation7] sm:$0xff]  ;;  %v233_v2 = vld [vmem:[#allocation8] sm:$0x7f]  ;;  %v128_v3 = vld [vmem:[#allocation2] sm:$0xff]  ;;  %vm241_vm3 = vcmask 56320   ;;  %s3349_s28 = sld [smem:[#allocation16_spill]] }
  0x46   :  { %2322 = vmatpush3.msra.mxu0 %v150_v1  ;;  %2326 = vmatprep.subr.msk.mxu1 %vm266_vm1, %v233_v2  ;;  %s3350_s7 = sld [smem:[#allocation24_spill]]  ;;  %v611_v15 = vld [vmem:[%s3318_s13 + $0x18] sm:$0xff]  ;;  %v610_v17 = vld [vmem:[%s3318_s13 + $0x10] sm:$0xff]  ;;  %v2920_v19 = vld [vmem:[%s3318_s13 + $0x8] sm:$0xff]  ;;  %vm394_vm4 = vcmask 261120   ;;  %vm1204_vm5 = vcmask 31744  }
  0x47   :  { %2324 = vmatmul.mubr.msk.f32.vlgmr.msra.gmra.mxu0 %vm158_vm2, %v128_v3  ;;  %2327 = vmatpush3.msk.msra.mxu1 %vm266_vm1, %v233_v2  ;;  %v471_v18 = vld [vmem:[%s3316_s11 + $0x18] sm:$0xff]  ;;  %v2927_v20 = vld [vmem:[%s3318_s13] sm:$0xff]  ;;  %s3351_s3 = sld [smem:[#allocation21_spill]]  ;;  %v470_v30 = vld [vmem:[%s3316_s11 + $0x10] sm:$0xff]  ;;  %vm1301_vm6 = vcmask 523264   ;;  %vm1513_vm7 = vcmask 1043456  }
  0x48   :  { %2340 = vmatprep.subr.mxu0 %v2709_v0  ;;  %2348 = vmatprep.mubr.msk.f32.mxu0 %vm2710_vm0, %v2709_v0  ;;  %s3352_s1 = sld [smem:[#allocation23_spill]]  ;;  %v469_v34 = vld [vmem:[%s3316_s11 + $0x8] sm:$0xff]  ;;  %v468_v38 = vld [vmem:[%s3316_s11] sm:$0xff]  ;;  %s2711_s30 = smov [#allocation10]  }
  0x49   :  { %2371 = vmatprep.subr.mxu1 %v611_v15  ;;  %s3353_s0 = sld [smem:[#allocation17_spill]]  ;;  %v2122_v3 = vld [vmem:[%s3315_s10] ss:$0 sm:$0xff] }
  0x4b   :  { %v129_v4 = vld [vmem:[%s3349_s28] sm:$0xff]  ;;  %v130_v5 = vld [vmem:[%s3349_s28 + $0x8] sm:$0xff]  ;;  %v131_v6 = vld [vmem:[%s3349_s28 + $0x10] sm:$0xff] }
  0x4c   :  { %2328 = vmatprep.mubr.msk.f32.mxu1 %vm241_vm3, %v129_v4  ;;  %v386_v7 = vld [vmem:[%s3350_s7 + $0x18] sm:$0xff]  ;;  %v385_v8 = vld [vmem:[%s3350_s7 + $0x10] sm:$0xff]  ;;  %v133_v10 = vld [vmem:[%s3349_s28 + $0x20] sm:$0xff] }
  0x4d   :  { %2329 = vmatmul.mubr.msk.f32.vlgmr.msra.gmra.mxu1 %vm241_vm3, %v130_v5  ;;  %2341 = vmatpush3.msra.mxu0 %v386_v7  ;;  %v132_v9 = vld [vmem:[%s3349_s28 + $0x18] sm:$0xff]  ;;  %v134_v11 = vld [vmem:[%s3349_s28 + $0x28] sm:$0xff]  ;;  %v135_v12 = vld [vmem:[%s3349_s28 + $0x30] sm:$0xff] }
  0x4e   :  { %2331 = vmatprep.mubr.msk.f32.mxu1 %vm241_vm3, %v131_v6  ;;  %2342 = vmatprep.subr.mxu0 %v2709_v0  ;;  %v136_v13 = vld [vmem:[%s3349_s28 + $0x38] sm:$0xff]  ;;  %v384_v14 = vld [vmem:[%s3350_s7 + $0x8] sm:$0xff]  ;;  %v383_v16 = vld [vmem:[%s3350_s7] sm:$0xff]  ;;  %s3354_s28 = sld [smem:[#allocation18_spill]] }
  0x4f   :  { %2343 = vmatpush3.msra.mxu0 %v385_v8  ;;  %2372 = vmatpush3.msra.mxu1 %v611_v15  ;;  %v2110_v21 = vld [vmem:[%s3351_s3] ss:$0 sm:$0xff]  ;;  %v2995_v55 = vld [vmem:[%s3353_s0 + $0x8] sm:$0xff]  ;;  %v3001_v56 = vld [vmem:[%s3353_s0 + $0x10] sm:$0xff] }
  0x50   :  { %2344 = vmatprep.subr.mxu0 %v2709_v0  ;;  %2373 = vmatprep.subr.mxu1 %v610_v17  ;;  %v2112_v23 = vld [vmem:[%s3352_s1] ss:$0 sm:$0xff]  ;;  %v3007_v57 = vld [vmem:[%s3353_s0 + $0x18] sm:$0xff]  ;;  %v3025_v61 = vld [vmem:[%s3353_s0 + $0x28] sm:$0xff] }
  0x51   :  { %2332 = vmatmul.mubr.msk.f32.gmra.mxu1 %vm241_vm3, %v132_v9  ;;  %2345 = vmatpush3.msra.mxu0 %v384_v14  ;;  %v2987_v54 = vld [vmem:[%s3353_s0] sm:$0xff]  ;;  %v3037_v1 = vld [vmem:[%s3353_s0 + $0x30] sm:$0xff]  ;;  %v3044_v2 = vld [vmem:[%s3353_s0 + $0x38] sm:$0xff] }
  0x52   :  { %2334 = vmatprep.mubr.msk.f32.mxu1 %vm241_vm3, %v133_v10  ;;  %2346 = vmatprep.subr.mxu0 %v2709_v0  ;;  %v3013_v58 = vld [vmem:[%s3353_s0 + $0x20] sm:$0xff] }
  0x53   :  { %2347 = vmatpush3.msra.mxu0 %v383_v16  ;;  %2374 = vmatpush3.msra.mxu1 %v610_v17  ;;  %v2124_v10 = vld [vmem:[%s3317_s12] ss:$0 sm:$0xff] }
  0x54   :  { %2351 = vmatprep.subr.mxu0 %v471_v18  ;;  %2375 = vmatprep.subr.mxu1 %v2920_v19  ;;  %v148_v59 = vld [vmem:[%s3354_s28 + $0x18] sm:$0xff]  ;;  %v147_v60 = vld [vmem:[%s3354_s28 + $0x10] sm:$0xff]  ;;  %v146_v62 = vld [vmem:[%s3354_s28 + $0x8] sm:$0xff] }
  0x55   :  { %2335 = vmatmul.mubr.msk.f32.gmra.mxu1 %vm241_vm3, %v134_v11  ;;  %1269 = vxpose.xlu1.b32.start [1/8] (short) (narrow) %v2987_v54, 8  ;;  %v145_v63 = vld [vmem:[%s3354_s28] sm:$0xff] }
  0x56   :  { %2337 = vmatprep.mubr.msk.f32.mxu1 %vm241_vm3, %v135_v12  ;;  %2376 = vmatpush3.msra.mxu1 %v2920_v19 }
  0x57   :  { %2377 = vmatprep.subr.mxu1 %v2927_v20 }
  0x58   :  { %2378 = vmatpush3.msra.mxu1 %v2927_v20 }
  0x59   :  { %2338 = vmatmul.mubr.msk.f32.gmra.mxu1 %vm241_vm3, %v136_v13  ;;  %2402 = vmatprep.subr.mxu1 %v2709_v0 }
  0x5a   :  { %1270 = vxpose.xlu1.b32.cont [2/8] (short) (narrow) %v2995_v55, 8 }
  0x5e   :  { %1271 = vxpose.xlu1.b32.cont [3/8] (short) (narrow) %v3001_v56, 8 }
  0x62   :  { %1272 = vxpose.xlu1.b32.cont [4/8] (short) (narrow) %v3007_v57, 8 }
  0x66   :  { %1273 = vxpose.xlu1.b32.cont [5/8] (short) (narrow) %v3013_v58, 8 }
  0x6a   :  { %1274 = vxpose.xlu1.b32.cont [6/8] (short) (narrow) %v3025_v61, 8 }
  0x6e   :  { %1275 = vxpose.xlu1.b32.cont [7/8] (short) (narrow) %v3037_v1, 8 }
  0x72   :  { %1276 = vxpose.xlu1.b32.end [8/8] (short) (narrow) %v3044_v2, 8 }
 0x107   :  { %v228_v22 = vpop.f32.mrf.mxu0 }
 0x108   :  { %v229_v24 = vadd.f32 %v2110_v21, %v228_v22 }
 0x109   :  { %v2325_v26 = vpop.f32.mrf.mxu0 }
 0x10a   :  { %v2938_v27 = vmax.f32 %v229_v24, 0.0  ;;  %v3094_v26 = vld [vmem:[%s3319_s14] ss:$0 sm:$0xff] }
 0x10c   :  { %2349 = vmatmul.mubr.msk.f32.vlgmr.msra.gmra.mxu0 %vm394_vm4, %v2938_v27 }
 0x10d   :  { %v2330_v25 = vpop.f32.mrf.mxu1  ;;  %2352 = vmatpush3.msra.mxu0 %v471_v18 }
 0x10e   :  { %v342_v28 = vadd.f32 %v2330_v25, %v2112_v23  ;;  %2353 = vmatprep.subr.mxu0 %v470_v30 }
 0x10f   :  { %v336_v29 = vpop.f32.mrf.mxu1  ;;  %2354 = vmatpush3.msra.mxu0 %v470_v30 }
 0x110   :  { %v337_v31 = vadd.f32 %v2112_v23, %v336_v29  ;;  %v376_v32 = vmax.f32 %v342_v28, 0.0  ;;  %2355 = vmatprep.subr.mxu0 %v469_v34 }
 0x111   :  { %v2333_v33 = vpop.f32.mrf.mxu1  ;;  %2356 = vmatpush3.msra.mxu0 %v469_v34 }
 0x112   :  { %v375_v35 = vmax.f32 %v337_v31, 0.0  ;;  %v352_v36 = vadd.f32 %v2333_v33, %v2112_v23  ;;  %2357 = vmatprep.subr.mxu0 %v468_v38 }
 0x113   :  { %v346_v37 = vpop.f32.mrf.mxu1  ;;  %2358 = vmatpush3.msra.mxu0 %v468_v38 }
 0x114   :  { %v347_v39 = vadd.f32 %v2112_v23, %v346_v37  ;;  %2379 = vmatprep.mubr.msk.f32.mxu1 %vm394_vm4, %v375_v35  ;;  %v378_v40 = vmax.f32 %v352_v36, 0.0  ;;  %2359 = vmatprep.mubr.msk.f32.mxu0 %vm394_vm4, %v375_v35 }
 0x115   :  { %v2336_v41 = vpop.f32.mrf.mxu1  ;;  %2380 = vmatmul.mubr.msk.f32.vlgmr.msra.gmra.mxu1 %vm394_vm4, %v376_v32  ;;  %2360 = vmatmul.mubr.msk.f32.vlgmr.msra.gmra.mxu0 %vm394_vm4, %v376_v32 }
 0x116   :  { %v377_v42 = vmax.f32 %v347_v39, 0.0  ;;  %v362_v43 = vadd.f32 %v2336_v41, %v2112_v23  ;;  %2403 = vmatpush3.msra.mxu1 %v611_v15  ;;  %2391 = vmatprep.subr.mxu0 %v2709_v0 }
 0x117   :  { %v356_v44 = vpop.f32.mrf.mxu1  ;;  %2404 = vmatprep.subr.mxu1 %v2709_v0  ;;  %2392 = vmatpush3.msra.mxu0 %v471_v18 }
 0x118   :  { %v357_v45 = vadd.f32 %v2112_v23, %v356_v44  ;;  %2382 = vmatprep.mubr.msk.f32.mxu1 %vm394_vm4, %v377_v42  ;;  %v380_v46 = vmax.f32 %v362_v43, 0.0  ;;  %2362 = vmatprep.mubr.msk.f32.mxu0 %vm394_vm4, %v377_v42 }
 0x119   :  { %v2339_v47 = vpop.f32.mrf.mxu1  ;;  %2383 = vmatmul.mubr.msk.f32.gmra.mxu1 %vm394_vm4, %v378_v40  ;;  %2363 = vmatmul.mubr.msk.f32.gmra.mxu0 %vm394_vm4, %v378_v40 }
 0x11a   :  { %v379_v48 = vmax.f32 %v357_v45, 0.0  ;;  %v372_v49 = vadd.f32 %v2339_v47, %v2112_v23  ;;  %2405 = vmatpush3.msra.mxu1 %v610_v17  ;;  %2393 = vmatprep.subr.mxu0 %v2709_v0 }
 0x11b   :  { %v366_v50 = vpop.f32.mrf.mxu1  ;;  %2406 = vmatprep.subr.mxu1 %v2709_v0  ;;  %2394 = vmatpush3.msra.mxu0 %v470_v30 }
 0x11c   :  { %v367_v51 = vadd.f32 %v2112_v23, %v366_v50  ;;  %2385 = vmatprep.mubr.msk.f32.mxu1 %vm394_vm4, %v379_v48  ;;  %v382_v52 = vmax.f32 %v372_v49, 0.0  ;;  %2365 = vmatprep.mubr.msk.f32.mxu0 %vm394_vm4, %v379_v48 }
 0x11d   :  { %2386 = vmatmul.mubr.msk.f32.gmra.mxu1 %vm394_vm4, %v380_v46  ;;  %2366 = vmatmul.mubr.msk.f32.gmra.mxu0 %vm394_vm4, %v380_v46 }
 0x11e   :  { %v381_v53 = vmax.f32 %v367_v51, 0.0  ;;  %2407 = vmatpush3.msra.mxu1 %v2920_v19  ;;  %2395 = vmatprep.subr.mxu0 %v2709_v0 }
 0x11f   :  { %2408 = vmatprep.subr.mxu1 %v2709_v0  ;;  %2396 = vmatpush3.msra.mxu0 %v469_v34 }
 0x120   :  { %2388 = vmatprep.mubr.msk.f32.mxu1 %vm394_vm4, %v381_v53  ;;  %2368 = vmatprep.mubr.msk.f32.mxu0 %vm394_vm4, %v381_v53 }
 0x121   :  { %2389 = vmatmul.mubr.msk.f32.gmra.mxu1 %vm394_vm4, %v382_v52  ;;  %2369 = vmatmul.mubr.msk.f32.gmra.mxu0 %vm394_vm4, %v382_v52 }
 0x122   :  { %2409 = vmatpush3.msra.mxu1 %v2927_v20  ;;  %2410 = vmatprep.mubr.msk.f32.mxu1 %vm2710_vm0, %v2709_v0 }
 0x123   :  { %2397 = vmatprep.subr.mxu0 %v2709_v0  ;;  %2399 = vmatprep.mubr.msk.f32.mxu0 %vm2710_vm0, %v2709_v0 }
 0x124   :  { %2398 = vmatpush3.msra.mxu0 %v468_v38  ;;  %2427 = vmatprep.subr.mxu1 %v148_v59 }
 0x125   :  { %2411 = vmatmul.mubr.msk.f32.vlgmr.msra.gmra.mxu1 %vm394_vm4, %v2938_v27  ;;  %2400 = vmatmul.mubr.msk.f32.vlgmr.msra.gmra.mxu0 %vm394_vm4, %v2938_v27 }
 0x126   :  { %2415 = vmatprep.mubr.msk.f32.mxu0 %vm158_vm2, %v2987_v54  ;;  %2428 = vmatpush3.msra.mxu1 %v148_v59 }
 0x127   :  { %2429 = vmatprep.subr.mxu1 %v147_v60 }
 0x128   :  { %2430 = vmatpush3.msra.mxu1 %v147_v60 }
 0x129   :  { %2431 = vmatprep.subr.mxu1 %v146_v62 }
 0x12a   :  { %2432 = vmatpush3.msra.mxu1 %v146_v62 }
 0x12b   :  { %2433 = vmatprep.subr.mxu1 %v145_v63 }
 0x12c   :  { %2434 = vmatpush3.msra.mxu1 %v145_v63 }
 0x12d   :  { %2458 = vmatprep.subr.mxu1 %v2709_v0 }
 0x1cc   :  { %v464_v4 = vpop.f32.mrf.mxu0 }
 0x1cd   :  { %v3050_v5 = vadd.f32 %v2122_v3, %v464_v4 }
 0x1ce   :  { %v2350_v6 = vpop.f32.mrf.mxu0 }
 0x1cf   :  { %2413 = vmatprep.subr.mxu0 %v3050_v5 }
 0x1d0   :  { %2414 = vmatpush3.msra.mxu0 %v3050_v5 }
 0x1d1   :  { %2416 = vmatmul.mubr.msk.f32.vlgmr.msra.gmra.mxu0 %vm158_vm2, %v2995_v55  ;;  %2447 = vmatprep.subr.mxu0 %v2709_v0 }
 0x1d2   :  { %2418 = vmatprep.mubr.msk.f32.mxu0 %vm158_vm2, %v3001_v56  ;;  %2448 = vmatpush3.msra.mxu0 %v148_v59 }
 0x1d3   :  { %2449 = vmatprep.subr.mxu0 %v2709_v0 }
 0x1d4   :  { %2450 = vmatpush3.msra.mxu0 %v147_v60 }
 0x1d5   :  { %v3054_v7 = vpop.f32.mrf.mxu1  ;;  %v2361_v9 = vpop.f32.mrf.mxu0  ;;  %2419 = vmatmul.mubr.msk.f32.gmra.mxu0 %vm158_vm2, %v3007_v57  ;;  %2451 = vmatprep.subr.mxu0 %v2709_v0 }
 0x1d6   :  { %v575_v11 = vadd.f32 %v2361_v9, %v2124_v10  ;;  %2421 = vmatprep.mubr.msk.f32.mxu0 %vm158_vm2, %v3013_v58  ;;  %2452 = vmatpush3.msra.mxu0 %v146_v62 }
 0x1d7   :  { %v3061_v8 = vpop.f32.mrf.mxu1  ;;  %v569_v13 = vpop.f32.mrf.mxu0  ;;  %2453 = vmatprep.subr.mxu0 %v2709_v0 }
 0x1d8   :  { %v570_v14 = vadd.f32 %v2124_v10, %v569_v13  ;;  %2454 = vmatpush3.msra.mxu0 %v145_v63 }
 0x1d9   :  { %v3067_v12 = vpop.f32.mrf.mxu1  ;;  %v2364_v16 = vpop.f32.mrf.mxu0  ;;  %2422 = vmatmul.mubr.msk.f32.gmra.mxu0 %vm158_vm2, %v3025_v61 }
 0x1da   :  { %v585_v17 = vadd.f32 %v2364_v16, %v2124_v10  ;;  %2424 = vmatprep.mubr.msk.f32.mxu0 %vm158_vm2, %v3037_v1 }
 0x1db   :  { %v3074_v15 = vpop.f32.mrf.mxu1  ;;  %v579_v19 = vpop.f32.mrf.mxu0 }
 0x1dc   :  { %v580_v20 = vadd.f32 %v2124_v10, %v579_v19 }
 0x1dd   :  { %v3077_v18 = vpop.f32.mrf.mxu1  ;;  %v2367_v22 = vpop.f32.mrf.mxu0  ;;  %2425 = vmatmul.mubr.msk.f32.gmra.mxu0 %vm158_vm2, %v3044_v2 }
 0x1de   :  { %v595_v23 = vadd.f32 %v2367_v22, %v2124_v10  ;;  %2455 = vmatprep.mubr.msk.f32.mxu0 %vm2710_vm0, %v2709_v0 }
 0x1df   :  { %v3083_v21 = vpop.f32.mrf.mxu1  ;;  %v589_v25 = vpop.f32.mrf.mxu0 }
 0x1e0   :  { %v590_v28 = vadd.f32 %v2124_v10, %v589_v25 }
 0x1e1   :  { %v3085_v24 = vpop.f32.mrf.mxu1  ;;  %v2370_v30 = vpop.f32.mrf.mxu0 }
 0x1e2   :  { %v605_v31 = vadd.f32 %v2370_v30, %v2124_v10 }
 0x1e3   :  { %v3096_v29 = vpop.f32.mrf.mxu1  ;;  %v599_v34 = vpop.f32.mrf.mxu0 }
 0x1e4   :  { %v600_v35 = vadd.f32 %v2124_v10, %v599_v34 }
 0x1e5   :  { %v860_v32 = vpop.f32.mrf.mxu1  ;;  %v790_v37 = vpop.f32.mrf.mxu0 }
 0x1e6   :  { %v3099_v33 = vadd.f32 %v3094_v26, %v860_v32  ;;  %v791_v38 = vadd.f32 %v2124_v10, %v790_v37 }
 0x1e7   :  { %v2412_v36 = vpop.f32.mrf.mxu1  ;;  %v2401_v39 = vpop.f32.mrf.mxu0 }
 0x1e8   :  { %v1130_v40 = vmul.f32 %v791_v38, %v3050_v5 }
 0x1ea   :  { %2456 = vmatmul.mubr.msk.f32.vlgmr.msra.gmra.mxu0 %vm394_vm4, %v1130_v40 }
 0x1eb   :  { %2479 = vmatprep.mubr.msk.f32.mxu0 %vm158_vm2, %v2987_v54 }
 0x291   :  { %v2417_v41 = vpop.f32.mrf.mxu0 }
 0x292   :  { %v994_v44 = vmul.f32 %v2417_v41, %v575_v11 }
 0x293   :  { %v954_v42 = vpop.f32.mrf.mxu0 }
 0x294   :  { %v993_v43 = vmul.f32 %v954_v42, %v570_v14 }
 0x295   :  { %v2420_v45 = vpop.f32.mrf.mxu0 }
 0x296   :  { %2435 = vmatprep.mubr.msk.f32.mxu1 %vm394_vm4, %v993_v43  ;;  %v996_v48 = vmul.f32 %v2420_v45, %v585_v17 }
 0x297   :  { %v964_v46 = vpop.f32.mrf.mxu0  ;;  %2436 = vmatmul.mubr.msk.f32.vlgmr.msra.gmra.mxu1 %vm394_vm4, %v994_v44 }
 0x298   :  { %v995_v47 = vmul.f32 %v964_v46, %v580_v20 }
 0x299   :  { %v2423_v49 = vpop.f32.mrf.mxu0 }
 0x29a   :  { %2438 = vmatprep.mubr.msk.f32.mxu1 %vm394_vm4, %v995_v47  ;;  %v998_v52 = vmul.f32 %v2423_v49, %v595_v23 }
 0x29b   :  { %v974_v50 = vpop.f32.mrf.mxu0  ;;  %2439 = vmatmul.mubr.msk.f32.gmra.mxu1 %vm394_vm4, %v996_v48 }
 0x29c   :  { %v997_v51 = vmul.f32 %v974_v50, %v590_v28 }
 0x29d   :  { %v2426_v53 = vpop.f32.mrf.mxu0 }
 0x29e   :  { %2441 = vmatprep.mubr.msk.f32.mxu1 %vm394_vm4, %v997_v51  ;;  %v1000_v60 = vmul.f32 %v2426_v53, %v605_v31 }
 0x29f   :  { %v984_v54 = vpop.f32.mrf.mxu0  ;;  %2442 = vmatmul.mubr.msk.f32.gmra.mxu1 %vm394_vm4, %v998_v52 }
 0x2a0   :  { %v999_v59 = vmul.f32 %v984_v54, %v600_v35 }
 0x2a2   :  { %2444 = vmatprep.mubr.msk.f32.mxu1 %vm394_vm4, %v999_v59 }
 0x2a3   :  { %2445 = vmatmul.mubr.msk.f32.gmra.mxu1 %vm394_vm4, %v1000_v60 }
 0x2a4   :  { %2474 = vmatprep.mubr.msk.f32.mxu1 %vm2710_vm0, %v2709_v0 }
 0x2aa   :  { %v3115_v62 = vpop.f32.mrf.mxu0 }
 0x2ab   :  { %v1230_v38 = vsel %vm1204_vm5, %v3115_v62, -inf }
 0x2ac   :  { %v2457_v63 = vpop.f32.mrf.mxu0 }
 0x357   :  { %v3117_v3 = vpop.f32.mrf.mxu1 }
 0x358   :  { %v1206_v23 = vsel %vm1204_vm5, %v3117_v3, -inf }
 0x359   :  { %v3119_v4 = vpop.f32.mrf.mxu1 }
 0x35a   :  { %v1205_v16 = vsel %vm1204_vm5, %v3119_v4, -inf }
 0x35b   :  { %v2440_v6 = vpop.f32.mrf.mxu1 }
 0x35c   :  { %v1208_v25 = vsel %vm1204_vm5, %v2440_v6, -inf }
 0x35d   :  { %v1101_v9 = vpop.f32.mrf.mxu1 }
 0x35e   :  { %v1207_v28 = vsel %vm1204_vm5, %v1101_v9, -inf }
 0x35f   :  { %v2443_v10 = vpop.f32.mrf.mxu1 }
 0x360   :  { %v1211_v17 = vsel %vm1204_vm5, %v2443_v10, -inf }
 0x361   :  { %v1111_v11 = vpop.f32.mrf.mxu1  ;;  %v1212_v31 = vmax.f32 %v1206_v23, %v1211_v17 }
 0x362   :  { %v1209_v13 = vsel %vm1204_vm5, %v1111_v11, -inf }
 0x363   :  { %v2446_v14 = vpop.f32.mrf.mxu1  ;;  %v1210_v20 = vmax.f32 %v1205_v16, %v1209_v13 }
 0x364   :  { %v1215_v19 = vsel %vm1204_vm5, %v2446_v14, -inf }
 0x365   :  { %v1121_v22 = vpop.f32.mrf.mxu1  ;;  %v1216_v32 = vmax.f32 %v1208_v25, %v1215_v19  ;;  %v1217_v35 = vmax.f32 %v1210_v20, %v1212_v31 }
 0x366   :  { %v1213_v30 = vsel %vm1204_vm5, %v1121_v22, -inf }
 0x367   :  { %v1214_v34 = vmax.f32 %v1207_v28, %v1213_v30 }
 0x369   :  { %v1218_v36 = vmax.f32 %v1214_v34, %v1216_v32 }
 0x36b   :  { %v1219_v37 = vmax.f32 %v1217_v35, %v1218_v36  ;;  %v3150_v36 = vpop.trf.xlu1 }
 0x36d   :  { %1220 = vmax.xlane.f32.xlu0 %v1219_v37 }
 0x371   :  { %1231 = vmax.xlane.f32.xlu0 %v1230_v38  ;;  %v149_v38 = vld [vmem:[#allocation5] sm:$0xf] }
 0x3f6   :  { %v1221_v39 = vpop.xlane.xlu0 %1220 }
 0x3f7   :  { %v1222_v40 = vrot.slane %v1221_v39, 4 }
 0x3f9   :  { %v1223_v41 = vmax.f32 %v1221_v39, %v1222_v40 }
 0x3fa   :  { %v1232_v42 = vpop.xlane.xlu0 %1231 }
 0x3fb   :  { %v1224_v43 = vrot.slane %v1223_v41, 2  ;;  %v1233_v44 = vrot.slane %v1232_v42, 4 }
 0x3fd   :  { %v1234_v45 = vmax.f32 %v1232_v42, %v1233_v44  ;;  %v1225_v46 = vmax.f32 %v1223_v41, %v1224_v43 }
 0x3ff   :  { %v1235_v47 = vrot.slane %v1234_v45, 2  ;;  %v1226_v48 = vrot.slane %v1225_v46, 1 }
 0x401   :  { %v1227_v49 = vmax.f32 %v1225_v46, %v1226_v48  ;;  %v1236_v50 = vmax.f32 %v1234_v45, %v1235_v47 }
 0x403   :  { %2562 = vpush %v1227_v49  ;;  %v1237_v51 = vrot.slane %v1236_v50, 1 }
 0x405   :  { %v1238_v52 = vmax.f32 %v1236_v50, %v1237_v51 }
 0x407   :  { %2564 = vpush %v1238_v52 }
 0x434   :  { %s2563_s14 = spop %2562 }
 0x435   :  { %v1229_v54 = vstv %s2563_s14 }
 0x438   :  { %s2565_s28 = spop %2564 }
 0x439   :  { %v1240_v53 = vstv %s2565_s28 }
 0x43a   :  { %v1241_v59 = vmax.f32 %v1229_v54, %v1240_v53 }
 0x43c   :  { %v1249_v60 = vsub.f32 %v2446_v14, %v1241_v59  ;;  %v1248_v63 = vsub.f32 %v1121_v22, %v1241_v59  ;;  %v1247_v13 = vsub.f32 %v2443_v10, %v1241_v59  ;;  %v1246_v17 = vsub.f32 %v1111_v11, %v1241_v59 }
 0x43d   :  { %v1245_v20 = vsub.f32 %v2440_v6, %v1241_v59  ;;  %v1244_v25 = vsub.f32 %v1101_v9, %v1241_v59  ;;  %v1243_v30 = vsub.f32 %v3117_v3, %v1241_v59  ;;  %v1242_v32 = vsub.f32 %v3119_v4, %v1241_v59 }
 0x43e   :  { %v1264_v16 = vmul.f32 1.442695, %v1249_v60  ;;  %v1262_v19 = vmul.f32 1.442695, %v1248_v63  ;;  %v1260_v23 = vmul.f32 1.442695, %v1247_v13  ;;  %v1266_v39 = vsub.f32 %v3115_v62, %v1241_v59 }
 0x43f   :  { %v1258_v28 = vmul.f32 1.442695, %v1246_v17  ;;  %v1256_v31 = vmul.f32 1.442695, %v1245_v20  ;;  %v1254_v34 = vmul.f32 1.442695, %v1244_v25  ;;  %v721_v25 = vadd.f32 %v3085_v24, %v3094_v26 }
 0x440   :  { %2573 = vpow2.f32 %v1264_v16  ;;  %v1252_v14 = vmul.f32 1.442695, %v1243_v30  ;;  %v1250_v10 = vmul.f32 1.442695, %v1242_v32  ;;  %v1267_v40 = vmul.f32 1.442695, %v1266_v39 }
 0x441   :  { %2575 = vpow2.f32 %v1262_v19  ;;  %v711_v32 = vadd.f32 %v3077_v18, %v3094_v26  ;;  %v701_v24 = vadd.f32 %v3067_v12, %v3094_v26  ;;  %v696_v18 = vadd.f32 %v3094_v26, %v3074_v15 }
 0x442   :  { %2577 = vpow2.f32 %v1260_v23  ;;  %v686_v12 = vadd.f32 %v3094_v26, %v3061_v8 }
 0x443   :  { %2579 = vpow2.f32 %v1258_v28 }
 0x444   :  { %2581 = vpow2.f32 %v1256_v31 }
 0x445   :  { %2583 = vpow2.f32 %v1254_v34 }
 0x446   :  { %2585 = vpow2.f32 %v1252_v14  ;;  %v706_v14 = vadd.f32 %v3094_v26, %v3083_v21  ;;  %v691_v21 = vadd.f32 %v3054_v7, %v3094_v26 }
 0x447   :  { %2587 = vpow2.f32 %v1250_v10 }
 0x448   :  { %2589 = vpow2.f32 %v1267_v40  ;;  %v1808_v40 = vld [vmem:[%s3320_s15 + $0x10] sm:$0xff] }
 0x44d   :  { %v3135_v11 = vpop.eup %2573 }
 0x44e   :  { %2459 = vmatpush3.msra.mxu1 %v3135_v11  ;;  %v3138_v6 = vpop.eup %2575 }
 0x44f   :  { %2460 = vmatprep.subr.mxu1 %v2709_v0  ;;  %v3142_v3 = vpop.eup %2577 }
 0x450   :  { %2461 = vmatpush3.msra.mxu1 %v3138_v6  ;;  %v2580_v4 = vpop.eup %2579 }
 0x451   :  { %2462 = vmatprep.subr.mxu1 %v2709_v0  ;;  %v2582_v9 = vpop.eup %2581 }
 0x452   :  { %2463 = vmatpush3.msra.mxu1 %v3142_v3  ;;  %v2584_v22 = vpop.eup %2583 }
 0x453   :  { %2464 = vmatprep.subr.mxu1 %v2709_v0  ;;  %v2586_v35 = vpop.eup %2585 }
 0x454   :  { %2465 = vmatpush3.msra.mxu1 %v2580_v4  ;;  %v2588_v37 = vpop.eup %2587 }
 0x455   :  { %2466 = vmatprep.subr.mxu1 %v2709_v0  ;;  %v2590_v41 = vpop.eup %2589 }
 0x456   :  { %2467 = vmatpush3.msra.mxu1 %v2582_v9 }
 0x457   :  { %2468 = vmatprep.subr.mxu1 %v2709_v0 }
 0x458   :  { %2469 = vmatpush3.msra.mxu1 %v2584_v22 }
 0x459   :  { %2470 = vmatprep.subr.mxu1 %v2709_v0 }
 0x45a   :  { %2471 = vmatpush3.msra.mxu1 %v2586_v35 }
 0x45b   :  { %2472 = vmatprep.subr.mxu1 %v2709_v0 }
 0x45c   :  { %2473 = vmatpush3.msra.mxu1 %v2588_v37 }
 0x45d   :  { %2475 = vmatmul.mubr.msk.f32.vlgmr.msra.gmra.mxu1 %vm1301_vm6, %v3150_v36  ;;  %2491 = vmatprep.subr.msk.mxu1 %vm1513_vm7, %v149_v38 }
 0x45e   :  { %2492 = vmatpush3.msk.msra.mxu1 %vm1513_vm7, %v149_v38 }
 0x45f   :  { %2510 = vmatprep.subr.mxu1 %v2709_v0 }
 0x51d   :  { %v1371_v42 = vpop.f32.mrf.mxu1 }
 0x51e   :  { %v1372_v43 = vadd.f32 %v2590_v41, %v1371_v42 }
 0x51f   :  { %v2476_v44 = vpop.f32.mrf.mxu1 }
 0x520   :  { %2591 = vrcp.f32 %v1372_v43 }
 0x52d   :  { %v2592_v45 = vpop.eup %2591 }
 0x52e   :  { %2477 = vmatprep.subr.mxu0 %v2592_v45 }
 0x52f   :  { %2478 = vmatpush3.msra.mxu0 %v2592_v45 }
 0x530   :  { %2480 = vmatmul.mubr.msk.f32.vlgmr.msra.gmra.mxu0 %vm158_vm2, %v2995_v55  ;;  %2505 = vmatprep.subr.mxu0 %v2709_v0  ;;  %v1622_v55 = vmul.f32 %v2592_v45, %v2590_v41  ;;  %v1806_v41 = vld [vmem:[%s3320_s15] sm:$0xff] }
 0x531   :  { %2482 = vmatprep.mubr.msk.f32.mxu0 %vm158_vm2, %v3001_v56  ;;  %2506 = vmatpush3.msk.msra.mxu0 %vm1513_vm7, %v149_v38 }
 0x532   :  { %2529 = vmatprep.subr.mxu0 %v2709_v0 }
 0x534   :  { %2483 = vmatmul.mubr.msk.f32.gmra.mxu0 %vm158_vm2, %v3007_v57 }
 0x535   :  { %2485 = vmatprep.mubr.msk.f32.mxu0 %vm158_vm2, %v3013_v58 }
 0x538   :  { %2486 = vmatmul.mubr.msk.f32.gmra.mxu0 %vm158_vm2, %v3025_v61 }
 0x539   :  { %2488 = vmatprep.mubr.msk.f32.mxu0 %vm158_vm2, %v3037_v1 }
 0x53c   :  { %2489 = vmatmul.mubr.msk.f32.gmra.mxu0 %vm158_vm2, %v3044_v2 }
 0x53d   :  { %2507 = vmatprep.mubr.msk.f32.mxu0 %vm2710_vm0, %v2709_v0 }
 0x540   :  { %2508 = vmatmul.mubr.msk.f32.vlgmr.msra.gmra.mxu0 %vm1204_vm5, %v1622_v55  ;;  %v2182_v55 = vld [vmem:[%s3322_s17] ss:$0 sm:$0xff] }
 0x541   :  { %2537 = vmatprep.mubr.msk.f32.mxu0 %vm2710_vm0, %v2709_v0 }
 0x5f0   :  { %v2481_v56 = vpop.f32.mrf.mxu0 }
 0x5f1   :  { %v1482_v62 = vmul.f32 %v2586_v35, %v2481_v56 }
 0x5f2   :  { %v1442_v57 = vpop.f32.mrf.mxu0 }
 0x5f3   :  { %v1481_v58 = vmul.f32 %v2588_v37, %v1442_v57  ;;  %v2183_v57 = vld [vmem:[%s3323_s18] ss:$0 sm:$0xff] }
 0x5f4   :  { %v2484_v61 = vpop.f32.mrf.mxu0 }
 0x5f5   :  { %2493 = vmatprep.mubr.msk.f32.mxu1 %vm1204_vm5, %v1481_v58  ;;  %v1484_v46 = vmul.f32 %v2582_v9, %v2484_v61  ;;  %v2184_v61 = vld [vmem:[%s3321_s16] ss:$0 sm:$0xff] }
 0x5f6   :  { %v1452_v1 = vpop.f32.mrf.mxu0  ;;  %2494 = vmatmul.mubr.msk.f32.vlgmr.msra.gmra.mxu1 %vm1204_vm5, %v1482_v62 }
 0x5f7   :  { %v1483_v2 = vmul.f32 %v2584_v22, %v1452_v1 }
 0x5f8   :  { %v2487_v47 = vpop.f32.mrf.mxu0 }
 0x5f9   :  { %2496 = vmatprep.mubr.msk.f32.mxu1 %vm1204_vm5, %v1483_v2  ;;  %v1486_v50 = vmul.f32 %v3142_v3, %v2487_v47 }
 0x5fa   :  { %v1462_v48 = vpop.f32.mrf.mxu0  ;;  %2497 = vmatmul.mubr.msk.f32.gmra.mxu1 %vm1204_vm5, %v1484_v46 }
 0x5fb   :  { %v1485_v49 = vmul.f32 %v2580_v4, %v1462_v48 }
 0x5fc   :  { %v2490_v51 = vpop.f32.mrf.mxu0 }
 0x5fd   :  { %2499 = vmatprep.mubr.msk.f32.mxu1 %vm1204_vm5, %v1485_v49  ;;  %v1488_v54 = vmul.f32 %v3135_v11, %v2490_v51 }
 0x5fe   :  { %v1472_v52 = vpop.f32.mrf.mxu0  ;;  %2500 = vmatmul.mubr.msk.f32.gmra.mxu1 %vm1204_vm5, %v1486_v50 }
 0x5ff   :  { %v1487_v53 = vmul.f32 %v3138_v6, %v1472_v52 }
 0x600   :  { %v1692_v59 = vpop.f32.mrf.mxu0 }
 0x601   :  { %v1704_v60 = vmul.f32 %v1692_v59, %v3099_v33  ;;  %2502 = vmatprep.mubr.msk.f32.mxu1 %vm1204_vm5, %v1487_v53  ;;  %v716_v33 = vadd.f32 %v3094_v26, %v3096_v29  ;;  %v1925_v59 = vld [vmem:[%s3326_s21 + $0x18] sm:$0xff] }
 0x602   :  { %2503 = vmatmul.mubr.msk.f32.gmra.mxu1 %vm1204_vm5, %v1488_v54  ;;  %v2509_v63 = vpop.f32.mrf.mxu0 }
 0x603   :  { %2526 = vmatprep.mubr.msk.f32.mxu1 %vm2710_vm0, %v2709_v0  ;;  %v1923_v63 = vld [vmem:[%s3326_s21 + $0x8] sm:$0xff] }
 0x6b6   :  { %v2495_v13 = vpop.f32.mrf.mxu1 }
 0x6b7   :  { %v1697_v3 = vmul.f32 %v2495_v13, %v691_v21  ;;  %v1922_v13 = vld [vmem:[%s3326_s21] sm:$0xff] }
 0x6b8   :  { %v1583_v16 = vpop.f32.mrf.mxu1  ;;  %v2190_v21 = vld [vmem:[%s3329_s24] ss:$0 sm:$0xff] }
 0x6b9   :  { %v1696_v4 = vmul.f32 %v1583_v16, %v686_v12  ;;  %v2010_v16 = vld [vmem:[%s3328_s23 + $0x18] sm:$0xff] }
 0x6ba   :  { %v2498_v17 = vpop.f32.mrf.mxu1 }
 0x6bb   :  { %v1699_v11 = vmul.f32 %v2498_v17, %v701_v24 }
 0x6bc   :  { %v1593_v19 = vpop.f32.mrf.mxu1 }
 0x6bd   :  { %v1698_v6 = vmul.f32 %v1593_v19, %v696_v18 }
 0x6be   :  { %v2501_v20 = vpop.f32.mrf.mxu1 }
 0x6bf   :  { %v1701_v10 = vmul.f32 %v2501_v20, %v711_v32 }
 0x6c0   :  { %v1603_v23 = vpop.f32.mrf.mxu1 }
 0x6c1   :  { %v1700_v29 = vmul.f32 %v1603_v23, %v706_v14  ;;  %v2008_v14 = vld [vmem:[%s3328_s23 + $0x8] sm:$0xff] }
 0x6c2   :  { %v2504_v28 = vpop.f32.mrf.mxu1 }
 0x6c3   :  { %v1703_v30 = vmul.f32 %v2504_v28, %v721_v25  ;;  %v2186_v25 = vld [vmem:[%s3324_s19] ss:$0 sm:$0xff] }
 0x6c4   :  { %v1613_v31 = vpop.f32.mrf.mxu1 }
 0x6c5   :  { %v1702_v34 = vmul.f32 %v1613_v31, %v716_v33  ;;  %2511 = vmatpush3.msra.mxu1 %v1703_v30  ;;  %v2187_v33 = vld [vmem:[%s3325_s20] ss:$0 sm:$0xff] }
 0x6c6   :  { %2512 = vmatprep.subr.mxu1 %v2709_v0 }
 0x6c7   :  { %2513 = vmatpush3.msra.mxu1 %v1702_v34  ;;  %v2009_v34 = vld [vmem:[%s3328_s23 + $0x10] sm:$0xff] }
 0x6c8   :  { %2514 = vmatprep.subr.mxu1 %v2709_v0 }
 0x6c9   :  { %2515 = vmatpush3.msra.mxu1 %v1701_v10  ;;  %v2007_v10 = vld [vmem:[%s3328_s23] sm:$0xff]  ;;  %s2099_s23 = sshll.u32 %s2711_s30, 4  ;;  %s2100_s23 = int_to_ptr.vmem [resolvable:$true] %s2099_s23 }
 0x6ca   :  { %2516 = vmatprep.subr.mxu1 %v2709_v0  ;;  %p2682_p7 = scmp.lt.s32.totalorder %s2100_s23, %s2100_s23 }
 0x6cb   :  { %2517 = vmatpush3.msra.mxu1 %v1700_v29 }
 0x6cc   :  { %2518 = vmatprep.subr.mxu1 %v2709_v0 }
 0x6cd   :  { %2519 = vmatpush3.msra.mxu1 %v1699_v11 }
 0x6ce   :  { %2520 = vmatprep.subr.mxu1 %v2709_v0 }
 0x6cf   :  { %2521 = vmatpush3.msra.mxu1 %v1698_v6 }
 0x6d0   :  { %2522 = vmatprep.subr.mxu1 %v2709_v0 }
 0x6d1   :  { %2523 = vmatpush3.msra.mxu1 %v1697_v3 }
 0x6d2   :  { %2524 = vmatprep.subr.mxu1 %v2709_v0 }
 0x6d3   :  { %2525 = vmatpush3.msra.mxu1 %v1696_v4 }
 0x6d4   :  { %2527 = vmatmul.mubr.msk.f32.vlgmr.msra.gmra.mxu1 %vm1301_vm6, %v3150_v36  ;;  %2540 = vmatprep.subr.mxu1 %v2709_v0  ;;  %v1809_v36 = vld [vmem:[%s3320_s15 + $0x18] sm:$0xff] }
 0x6d5   :  { %2548 = vmatprep.mubr.msk.f32.mxu1 %vm2710_vm0, %v2709_v0  ;;  %2530 = vmatpush3.msra.mxu0 %v1809_v36 }
 0x6d6   :  { %2531 = vmatprep.subr.mxu0 %v2709_v0  ;;  %2541 = vmatpush3.msra.mxu1 %v1925_v59 }
 0x6d7   :  { %2532 = vmatpush3.msra.mxu0 %v1808_v40  ;;  %2542 = vmatprep.subr.mxu1 %v2709_v0 }
 0x6d8   :  { %2533 = vmatprep.subr.mxu0 %v2709_v0 }
 0x794   :  { %v1771_v7 = vpop.f32.mrf.mxu1 }
 0x795   :  { %v1772_v15 = vadd.f32 %v1771_v7, %v1704_v60  ;;  %v1924_v60 = vld [vmem:[%s3326_s21 + $0x10] sm:$0xff] }
 0x796   :  { %v2528_v8 = vpop.f32.mrf.mxu1  ;;  %2543 = vmatpush3.msra.mxu1 %v1924_v60 }
 0x797   :  { %v1775_v26 = vadd.f32 %v1772_v15, %v3050_v5  ;;  %v1807_v5 = vld [vmem:[%s3320_s15 + $0x8] sm:$0xff]  ;;  %2544 = vmatprep.subr.mxu1 %v2709_v0 }
 0x798   :  { %2534 = vmatpush3.msra.mxu0 %v1807_v5  ;;  %2545 = vmatpush3.msra.mxu1 %v1923_v63 }
 0x799   :  { %v1778_v9 = vsel %vm394_vm4, %v1775_v26, 0.0  ;;  %2535 = vmatprep.subr.mxu0 %v2709_v0  ;;  %2546 = vmatprep.subr.mxu1 %v2709_v0 }
 0x79a   :  { %1779 = vadd.xlane.f32.xlu0 %v1778_v9  ;;  %2536 = vmatpush3.msra.mxu0 %v1806_v41 }
 0x79b   :  { %2551 = vmatprep.subr.mxu0 %v2709_v0  ;;  %2547 = vmatpush3.msra.mxu1 %v1922_v13 }
 0x823   :  { %v1780_v22 = vpop.xlane.xlu0 %1779 }
 0x824   :  { %v1782_v35 = vmul.f32 0.03125, %v1780_v22 }
 0x826   :  { %v1783_v37 = vsub.f32 %v1775_v26, %v1782_v35 }
 0x828   :  { %v1784_v38 = vmul.f32 %v1783_v37, %v1783_v37 }
 0x82a   :  { %v1785_v39 = vsel %vm394_vm4, %v1784_v38, 0.0 }
 0x82b   :  { %1786 = vadd.xlane.f32.xlu0 %v1785_v39 }
 0x8b4   :  { %v1787_v42 = vpop.xlane.xlu0 %1786 }
 0x8b5   :  { %v1788_v43 = vmul.f32 0.03125, %v1787_v42 }
 0x8b7   :  { %v1789_v44 = vadd.f32 1e-05, %v1788_v43 }
 0x8b9   :  { %2593 = vrsqrt.f32 %v1789_v44 }
 0x8c6   :  { %v2594_v45 = vpop.eup %2593 }
 0x8c7   :  { %v1791_v56 = vmul.f32 %v2594_v45, %v1783_v37 }
 0x8c9   :  { %v1798_v58 = vmul.f32 %v2182_v55, %v1791_v56 }
 0x8cb   :  { %v1805_v62 = vadd.f32 %v2183_v57, %v1798_v58 }
 0x8cd   :  { %2538 = vmatmul.mubr.msk.f32.vlgmr.msra.gmra.mxu0 %vm394_vm4, %v1805_v62 }
 0x8ce   :  { %2559 = vmatprep.mubr.msk.f32.mxu0 %vm2710_vm0, %v2709_v0  ;;  %2552 = vmatpush3.msra.mxu0 %v2010_v16 }
 0x8cf   :  { %2553 = vmatprep.subr.mxu0 %v2709_v0 }
 0x8d0   :  { %2554 = vmatpush3.msra.mxu0 %v2009_v34 }
 0x8d1   :  { %2555 = vmatprep.subr.mxu0 %v2709_v0 }
 0x8d2   :  { %2556 = vmatpush3.msra.mxu0 %v2008_v14 }
 0x8d3   :  { %2557 = vmatprep.subr.mxu0 %v2709_v0 }
 0x8d4   :  { %2558 = vmatpush3.msra.mxu0 %v2007_v10 }
 0x98d   :  { %v1886_v1 = vpop.f32.mrf.mxu0 }
 0x98e   :  { %v1887_v2 = vadd.f32 %v2184_v61, %v1886_v1 }
 0x98f   :  { %v2539_v46 = vpop.f32.mrf.mxu0 }
 0x990   :  { %v1890_v47 = vmax.f32 %v1887_v2, 0.0 }
 0x992   :  { %v1891_v48 = vadd.f32 %v1890_v47, %v1805_v62 }
 0x994   :  { %v1894_v49 = vsel %vm394_vm4, %v1891_v48, 0.0 }
 0x995   :  { %1895 = vadd.xlane.f32.xlu0 %v1894_v49 }
 0xa1e   :  { %v1896_v50 = vpop.xlane.xlu0 %1895 }
 0xa1f   :  { %v1897_v51 = vmul.f32 0.03125, %v1896_v50 }
 0xa21   :  { %v1898_v52 = vsub.f32 %v1891_v48, %v1897_v51 }
 0xa23   :  { %v1899_v53 = vmul.f32 %v1898_v52, %v1898_v52 }
 0xa25   :  { %v1900_v54 = vsel %vm394_vm4, %v1899_v53, 0.0 }
 0xa26   :  { %1901 = vadd.xlane.f32.xlu0 %v1900_v54 }
 0xaaf   :  { %v1902_v17 = vpop.xlane.xlu0 %1901 }
 0xab0   :  { %v1903_v19 = vmul.f32 0.03125, %v1902_v17 }
 0xab2   :  { %v1904_v20 = vadd.f32 1e-05, %v1903_v19 }
 0xab4   :  { %2595 = vrsqrt.f32 %v1904_v20 }
 0xac1   :  { %v2596_v23 = vpop.eup %2595 }
 0xac2   :  { %v1906_v28 = vmul.f32 %v2596_v23, %v1898_v52 }
 0xac4   :  { %v1913_v30 = vmul.f32 %v2186_v25, %v1906_v28 }
 0xac6   :  { %v1920_v31 = vadd.f32 %v2187_v33, %v1913_v30 }
 0xac8   :  { %v1921_v32 = vadd.f32 %v1920_v31, %v2938_v27  ;;  %v2188_v27 = vld [vmem:[%s3327_s22] ss:$0 sm:$0xff]  ;;  %s2677_s22 = scalar_lea.vmem %s2100_s23, 128 }
 0xac9   :  { %p2678_p6 = scmp.ne.s32.totalorder %s2100_s23, %s2677_s22  ;;  %p2683_p8 = scmp.lt.s32.totalorder %s2677_s22, %s2677_s22 }
 0xaca   :  { %2549 = vmatmul.mubr.msk.f32.vlgmr.msra.gmra.mxu1 %vm394_vm4, %v1921_v32 }
 0xacb   :  { %p2684_p9 = por %p2683_p8, %p2682_p7 }
 0xacd   :  { %p2685_p10 = pnand %p2684_p9, %p2678_p6 }
 0xb8a   :  { %v2002_v24 = vpop.f32.mrf.mxu1 }
 0xb8b   :  { %v2003_v29 = vadd.f32 %v2188_v27, %v2002_v24 }
 0xb8c   :  { %v2550_v18 = vpop.f32.mrf.mxu1 }
 0xb8d   :  { %v2006_v11 = vmax.f32 %v2003_v29, 0.0 }
 0xb8f   :  { %2560 = vmatmul.mubr.msk.f32.vlgmr.msra.gmra.mxu0 %vm394_vm4, %v2006_v11 }
 0xc4f   :  { %v2087_v6 = vpop.f32.mrf.mxu0 }
 0xc50   :  { %v2088_v12 = vadd.f32 %v2190_v21, %v2087_v6 }
 0xc51   :  { %v2561_v0 = vpop.f32.mrf.mxu0 }
 0xc52   :  { %v2091_v3 = vmax.f32 %v2088_v12, 0.0 }
 0xc54   :  { %2092 = vst.msk [vmem:[#allocation10] sm:$0xff] %vm394_vm4, %v2091_v3 }
 0xc55   :  { %2688 = shalt.err (!%p2685_p10)
}
 0xc56   :  { %2102 = dma.vmem_to_hbm [thread:$0]  %s2100_s23, 128, %s3330_s25, [#allocation4]  }
 0xc57   :  { %2703 = dma.done.wait [#allocation4], 128  }
 0xc58   :  { %2704 = vsyncadd [#allocation4], 4294967168 }
 0xc59   :  { %2106 = vsyncpa [#allocation3], 1 }
 0xc5a   :  { %2107 = vsyncpa [#allocation6], 1 }
 0xc5b   :  { %2108 = vsyncpa [#allocation9], 1 }
 0xc5c   :  { %2109 = vsyncpa [#allocation4], 1 }

</bundles_post_ra>
